<compile_context>
chip_gen: v7x
topology: tpu7x:2x2x1
jax: 0.10.0
libtpu: 0.0.40
codegen_flags: <defaults>
</compile_context>

<pallas_src>
import functools
import math

import jax
import jax.numpy as jnp
from jax.experimental import pallas as pl
from jax.experimental.pallas import tpu as pltpu

_OUT_PAD = 128                            # lane-dense padded width per head
_DN_NT = (((1,), (1,)), ((), ()))         # a @ b.T (contract last dims)


# ---------------------------------------------------------------------------
# In-kernel helpers (operate on traced VMEM values)
# ---------------------------------------------------------------------------
def _layernorm(x, g, b, eps):
    mu = jnp.mean(x, axis=-1, keepdims=True)
    xc = x - mu
    var = jnp.mean(xc * xc, axis=-1, keepdims=True)
    return xc * jax.lax.rsqrt(var + eps) * g + b


def _erf(x):
    # Abramowitz & Stegun 7.1.26 rational approximation (|err| < 1.5e-7).  The
    # divide goes through the EUP (approx reciprocal) so the GELU epilogue on
    # the d_inner-wide tensor stays off the VALU.
    a1, a2, a3, a4, a5 = (0.254829592, -0.284496736, 1.421413741,
                          -1.453152027, 1.061405429)
    pp = 0.3275911
    ax = jnp.abs(x)
    t = pl.reciprocal(1.0 + pp * ax, approx=True)
    poly = ((((a5 * t + a4) * t + a3) * t + a2) * t + a1) * t
    y = 1.0 - poly * jnp.exp(-(ax * ax))
    return jnp.where(x >= 0.0, y, -y)


def _gelu_exact(x):
    return 0.5 * x * (1.0 + _erf(x * (1.0 / math.sqrt(2.0))))


def _rel_shift(bd_full, seq_len):
    # XLNet rel_shift_bnij: out[..., i, j] = bd_full[..., i, S - i + j].
    # Implemented as a log2(S) barrel shifter (uniform lane rolls built from
    # two static slices + concat, gated by the bits of the row index) instead
    # of S unaligned slices + an S-way concat.
    S = seq_len
    P = 2 * S
    # uniform roll left by S
    x = jnp.concatenate([bd_full[..., S:], bd_full[..., :S]], axis=-1)
    row = jax.lax.broadcasted_iota(jnp.int32, x.shape, x.ndim - 2)
    shift = 1
    while shift < S:                      # per-row extra roll right by `i`
        rolled = jnp.concatenate(
            [x[..., P - shift:], x[..., :P - shift]], axis=-1)
        x = jnp.where((row & shift) != 0, rolled, x)
        shift *= 2
    return x[..., :S]


# ---------------------------------------------------------------------------
# The fused forward kernel: grid = (batch_blocks, n_layers)
# ---------------------------------------------------------------------------
def _fused_forward_kernel(
        # inputs
        h0_ref, kr_ref, qkv_w_ref, o_w_ref, rwb_ref, rrb_ref,
        ln1_g_ref, ln1_b_ref, ff_w1_ref, ff_b1_ref, ff_w2_ref, ff_b2_ref,
        ln2_g_ref, ln2_b_ref,
        rec_w1_ref, rec_b1_ref, rec_lng_ref, rec_lnb_ref,
        rec_w2_ref, rec_b2_ref, cls_w_ref, cls_b_ref,
        # outputs
        out_ref,
        # scratch
        h_scr,
        *, b_tile, n_heads, d_head, seq_len):
    layer = pl.program_id(1)
    n_layers = pl.num_programs(1)
    S, H, dh = seq_len, n_heads, d_head
    Hdh = H * dh
    R = b_tile * S
    scale = 1.0 / math.sqrt(dh)

    @pl.when(layer == 0)
    def _():
        h_scr[...] = h0_ref[...]

    h = h_scr[...]                                          # (R, D) f32

    # ---- fused Q|K|V projection (bf16 MXU operands, f32 accumulate) --------
    qkv = jnp.dot(h.astype(jnp.bfloat16), qkv_w_ref[...],
                  preferred_element_type=jnp.float32)       # (R, 3*H*dh)
    kr = kr_ref[...]                                        # (2S, H*dh) bf16
    rwb = rwb_ref[...]                                      # (H, dh) f32
    rrb = rrb_ref[...]

    # ---- relative multi-head attention (batched over B_TILE per head) ------
    # TODO(synk): heads are a static Python loop (H small); a fully
    # head-batched 4-D dot_general needs a (B,H,S,dh) relayout that is not
    # worth the lowering risk at dh=16.
    head_outs = []
    for hh in range(H):
        lo = hh * dh
        q_h = qkv[:, lo:lo + dh]                                       # (R, dh)
        k_h = qkv[:, Hdh + lo:Hdh + lo + dh].reshape(
            b_tile, S, dh).astype(jnp.bfloat16)
        v_h = qkv[:, 2 * Hdh + lo:2 * Hdh + lo + dh].reshape(
            b_tile, S, dh).astype(jnp.bfloat16)
        kr_h = kr[:, lo:lo + dh]                                       # (2S, dh)

        q_ac = (q_h + rwb[hh:hh + 1, :]).reshape(
            b_tile, S, dh).astype(jnp.bfloat16)
        q_bd = (q_h + rrb[hh:hh + 1, :]).astype(jnp.bfloat16)          # (R, dh)

        ac = jnp.einsum('bid,bjd->bij', q_ac, k_h,
                        preferred_element_type=jnp.float32)            # (b,S,S)
        bd_full = jax.lax.dot_general(
            q_bd, kr_h, _DN_NT,
            preferred_element_type=jnp.float32)                        # (R,2S)
        bd = _rel_shift(bd_full.reshape(b_tile, S, 2 * S), S)          # (b,S,S)

        s = (ac + bd) * scale     # ef == 0 (no segments); attn mask all-ones
        m = jnp.max(s, axis=-1, keepdims=True)
        e = jnp.exp(s - m)
        p = e * pl.reciprocal(jnp.sum(e, axis=-1, keepdims=True),
                              approx=True)
        av = jnp.einsum('bij,bjd->bid', p.astype(jnp.bfloat16), v_h,
                        preferred_element_type=jnp.float32)            # (b,S,dh)
        head_outs.append(av.reshape(R, dh))

    attn_flat = jnp.concatenate(head_outs, axis=-1)                    # (R,H*dh)

    # ---- output projection + residual + LayerNorm ---------------------------
    attn_out = jnp.dot(attn_flat.astype(jnp.bfloat16), o_w_ref[...],
                       preferred_element_type=jnp.float32)             # (R, D)
    h = _layernorm(attn_out + h, ln1_g_ref[...], ln1_b_ref[...], 1e-12)

    # ---- position-wise FFN ---------------------------------------------------
    ff1 = jnp.dot(h.astype(jnp.bfloat16), ff_w1_ref[...],
                  preferred_element_type=jnp.float32) + ff_b1_ref[...]
    ff1 = _gelu_exact(ff1)
    ff2 = jnp.dot(ff1.astype(jnp.bfloat16), ff_w2_ref[...],
                  preferred_element_type=jnp.float32) + ff_b2_ref[...]
    h = _layernorm(ff2 + h, ln2_g_ref[...], ln2_b_ref[...], 1e-12)

    h_scr[...] = h                        # carry across layer grid steps

    # ---- heads, only after the last encoder layer ---------------------------
    @pl.when(layer == n_layers - 1)
    def _():
        r1 = jnp.dot(h.astype(jnp.bfloat16), rec_w1_ref[...],
                     preferred_element_type=jnp.float32) + rec_b1_ref[...]
        r1 = jnp.maximum(
            _layernorm(r1, rec_lng_ref[...], rec_lnb_ref[...], 1e-5), 0.0)
        rec = jnp.dot(r1.astype(jnp.bfloat16), rec_w2_ref[...],
                      preferred_element_type=jnp.float32) + rec_b2_ref[...]
        cls = jnp.dot(h.astype(jnp.bfloat16), cls_w_ref[...],
                      preferred_element_type=jnp.float32) + cls_b_ref[...]
        # single lane-dense (R, 256) store; wrapper slices the real columns
        out_ref[...] = jnp.concatenate([rec, cls], axis=-1)


# ---------------------------------------------------------------------------
# Plain-JAX glue (embedding gather, sinusoids, batch-invariant kr) + params
# ---------------------------------------------------------------------------
def relative_positional_encoding(qlen, klen, d_model):
    # XLNet "bi" attention, bi_data=False, clamp_len=-1.
    freq_seq = jnp.arange(0, d_model, 2.0, dtype=jnp.float32)
    inv_freq = 1.0 / (10000.0 ** (freq_seq / d_model))
    pos_seq = jnp.arange(klen, -qlen, -1.0, dtype=jnp.float32)   # (klen+qlen,)
    sinusoid = pos_seq[:, None] * inv_freq[None, :]
    return jnp.concatenate([jnp.sin(sinusoid), jnp.cos(sinusoid)], axis=-1)


def init_params(key, *, vocab_size, n_features, d_model, n_heads, n_layers,
                d_inner, max_len):
    d_model = d_model // n_features // n_heads * n_features * n_heads
    feature_dim = d_model // n_features
    d_head = d_model // n_heads
    L, D, H, dh = n_layers, d_model, n_heads, d_head
    D2 = D // 2
    keys = iter(jax.random.split(key, 64))
    bf = jnp.bfloat16

    def nrm(shape, scale=0.02, dtype=jnp.float32):
        return (scale * jax.random.normal(next(keys), shape,
                                          jnp.float32)).astype(dtype)

    def pad_cols(w, width):
        return jnp.pad(w, ((0, 0), (0, width - w.shape[1])))

    # Weights pre-stacked over layers, pre-laid-out for the fused kernel
    # (q|k|v concatenated, output projection pre-transposed, matmul weights in
    # bf16, head output weights zero-padded to a lane-dense 128-wide slab).
    params = {
        "token_emb": [nrm((vocab_size, feature_dim), 1.0)
                      for _ in range(n_features)],
        "pos_emb": nrm((1, max_len, D), 1.0),             # torch.randn
        "attention_threshold": jnp.float32(0.1),          # unused in fwd path
        "qkv_w": nrm((L, D, 3 * H * dh), dtype=bf),
        "r_w": nrm((L, D, H * dh)),                       # consumed by wrapper
        "o_w": nrm((L, H * dh, D), dtype=bf),             # == o.reshape(D,.).T
        "r_w_bias": nrm((L, H, dh)),
        "r_r_bias": nrm((L, H, dh)),
        "ln1_g": jnp.ones((L, 1, D), jnp.float32),
        "ln1_b": jnp.zeros((L, 1, D), jnp.float32),
        "ff_w1": nrm((L, D, d_inner), dtype=bf),
        "ff_b1": jnp.zeros((L, 1, d_inner), jnp.float32),
        "ff_w2": nrm((L, d_inner, D), dtype=bf),
        "ff_b2": jnp.zeros((L, 1, D), jnp.float32),
        "ln2_g": jnp.ones((L, 1, D), jnp.float32),
        "ln2_b": jnp.zeros((L, 1, D), jnp.float32),
        "rec_w1": nrm((D, D2), dtype=bf),
        "rec_b1": jnp.zeros((1, D2), jnp.float32),
        "rec_ln_g": jnp.ones((1, D2), jnp.float32),
        "rec_ln_b": jnp.zeros((1, D2), jnp.float32),
        "rec_w2": pad_cols(nrm((D2, n_features)), _OUT_PAD).astype(bf),
        "rec_b2": jnp.zeros((1, _OUT_PAD), jnp.float32),
        "cls_w": pad_cols(nrm((D, 2)), _OUT_PAD).astype(bf),
        "cls_b": jnp.zeros((1, _OUT_PAD), jnp.float32),
    }
    return params


def _pick_b_tile(batch, seq):
    # Target ~128 matmul rows per grid step; if that collapses the batch axis
    # to a single block, try to keep >=2 parallel blocks (v7x has 2 TCs) as
    # long as each block still has >=64 rows.
    bt = max(1, min(batch, pl.cdiv(128, seq)))
    while bt > 1 and batch % bt:
        bt -= 1
    if batch // bt < 2:
        for cand in range(bt // 2, 0, -1):
            if batch % cand == 0 and cand * seq >= 64:
                bt = cand
                break
    return bt


def forward(params, x):
    """x: (B, S, n_features) floats holding token ids (as in the PyTorch
    module).  Returns (reconstructed (B,S,n_features), logits (B,S,2))."""
    B, S, n_features = x.shape
    D = params["pos_emb"].shape[-1]
    L, H, dh = params["r_w_bias"].shape

    # --- XLA glue: embedding gathers, sinusoids, batch-invariant kr ----------
    tokens = x.astype(jnp.int32)
    embs = [jnp.take(params["token_emb"][i], tokens[:, :, i], axis=0)
            for i in range(n_features)]
    h0 = jnp.concatenate(embs, axis=-1) + params["pos_emb"][:, :S, :]  # (B,S,D)
    h0 = h0.reshape(B * S, D)

    posrel = relative_positional_encoding(S, S, D)                     # (2S, D)
    kr = jnp.einsum("pd,ldf->lpf", posrel,
                    params["r_w"]).astype(jnp.bfloat16)                # (L,2S,H*dh)

    b_tile = _pick_b_tile(B, S)
    if (b_tile * S) % 8 != 0:
        b_tile = B                        # full block is always layout-legal
    nb = B // b_tile
    R = b_tile * S

    per_layer = (kr, params["qkv_w"], params["o_w"],
                 params["r_w_bias"], params["r_r_bias"],
                 params["ln1_g"], params["ln1_b"],
                 params["ff_w1"], params["ff_b1"],
                 params["ff_w2"], params["ff_b2"],
                 params["ln2_g"], params["ln2_b"])
    const = (params["rec_w1"], params["rec_b1"],
             params["rec_ln_g"], params["rec_ln_b"],
             params["rec_w2"], params["rec_b2"],
             params["cls_w"], params["cls_b"])

    def layer_spec(a):      # stream one layer's block per layer grid step
        return pl.BlockSpec((None,) + a.shape[1:], lambda b, l: (l, 0, 0))

    def const_spec(a):      # fetched once, block index never changes
        return pl.BlockSpec(a.shape, lambda b, l: (0, 0))

    in_specs = ([pl.BlockSpec((R, D), lambda b, l: (b, 0))]
                + [layer_spec(a) for a in per_layer]
                + [const_spec(a) for a in const])

    kernel = functools.partial(_fused_forward_kernel, b_tile=b_tile,
                               n_heads=H, d_head=dh, seq_len=S)

    # TODO(synk): matmuls use bf16 operands with f32 accumulation; pass f32
    # weights if bit-level fp32 parity with the PyTorch module is required.
    out = pl.pallas_call(
        kernel,
        grid=(nb, L),
        out_shape=jax.ShapeDtypeStruct((B * S, 2 * _OUT_PAD), jnp.float32),
        in_specs=in_specs,
        out_specs=pl.BlockSpec((R, 2 * _OUT_PAD), lambda b, l: (b, 0)),
        scratch_shapes=[pltpu.VMEM((R, D), jnp.float32)],
        compiler_params=pltpu.CompilerParams(
            dimension_semantics=("parallel", "arbitrary"),
            vmem_limit_bytes=32 * 1024 * 1024),
    )(h0, *per_layer, *const)

    out = out.reshape(B, S, 2 * _OUT_PAD)
    reconstructed = out[..., :n_features]
    logits = out[..., _OUT_PAD:_OUT_PAD + 2]
    return reconstructed, logits


if __name__ == "__main__":
    # Small shapes consistent with the module:
    #   batch=2, seq=8, n_features=2, vocab=16, d_model=64, heads=4, layers=2
    # TODO(synk): d_inner normally comes from the pretrained XLNet config
    # (3072); fixed in-script to 128 for this synthetic run.
    B, S, NF = 2, 8, 2
    VOCAB, DMODEL, NHEADS, NLAYERS, DINNER, MAXLEN = 16, 64, 4, 2, 128, 16

    key = jax.random.PRNGKey(0)
    kparam, kx = jax.random.split(key)
    params = init_params(kparam, vocab_size=VOCAB, n_features=NF,
                         d_model=DMODEL, n_heads=NHEADS, n_layers=NLAYERS,
                         d_inner=DINNER, max_len=MAXLEN)

    x = jax.random.randint(kx, (B, S, NF), 0, VOCAB).astype(jnp.float32)

    fwd = jax.jit(forward)
    reconstructed, logits = fwd(params, x)
    jax.block_until_ready((reconstructed, logits))

    assert reconstructed.shape == (B, S, NF) and logits.shape == (B, S, 2)
    assert bool(jnp.all(jnp.isfinite(reconstructed)))
    assert bool(jnp.all(jnp.isfinite(logits)))
    print("KERNEL_OK")
</pallas_src>

<mosaic_0001>
module attributes {stable_mosaic.version = 11 : i64} {
  func.func @_fused_forward_kernel(%arg0: i32, %arg1: i32, %arg2: memref<16x64xf32, #tpu.memory_space<vmem>>, %arg3: memref<1x16x64xbf16, #tpu.memory_space<vmem>>, %arg4: memref<1x64x192xbf16, #tpu.memory_space<vmem>>, %arg5: memref<1x64x64xbf16, #tpu.memory_space<vmem>>, %arg6: memref<1x4x16xf32, #tpu.memory_space<vmem>>, %arg7: memref<1x4x16xf32, #tpu.memory_space<vmem>>, %arg8: memref<1x1x64xf32, #tpu.memory_space<vmem>>, %arg9: memref<1x1x64xf32, #tpu.memory_space<vmem>>, %arg10: memref<1x64x128xbf16, #tpu.memory_space<vmem>>, %arg11: memref<1x1x128xf32, #tpu.memory_space<vmem>>, %arg12: memref<1x128x64xbf16, #tpu.memory_space<vmem>>, %arg13: memref<1x1x64xf32, #tpu.memory_space<vmem>>, %arg14: memref<1x1x64xf32, #tpu.memory_space<vmem>>, %arg15: memref<1x1x64xf32, #tpu.memory_space<vmem>>, %arg16: memref<64x32xbf16, #tpu.memory_space<vmem>>, %arg17: memref<1x32xf32, #tpu.memory_space<vmem>>, %arg18: memref<1x32xf32, #tpu.memory_space<vmem>>, %arg19: memref<1x32xf32, #tpu.memory_space<vmem>>, %arg20: memref<32x128xbf16, #tpu.memory_space<vmem>>, %arg21: memref<1x128xf32, #tpu.memory_space<vmem>>, %arg22: memref<64x128xbf16, #tpu.memory_space<vmem>>, %arg23: memref<1x128xf32, #tpu.memory_space<vmem>>, %arg24: memref<16x256xf32, #tpu.memory_space<vmem>>, %arg25: memref<16x64xf32, #tpu.memory_space<vmem>>) attributes {dimension_semantics = [#tpu.dimension_semantics<parallel>, #tpu.dimension_semantics<arbitrary>], iteration_bounds = array<i64: 1, 2>, scalar_prefetch = 0 : i64, scratch_operands = 1 : i64, tpu.core_type = #tpu.core_type<tc>, window_params = [{transform_indices = @transform_0, window_bounds = array<i64: 16, 64>}, {transform_indices = @transform_1, window_bounds = array<i64: 1, 16, 64>}, {transform_indices = @transform_2, window_bounds = array<i64: 1, 64, 192>}, {transform_indices = @transform_3, window_bounds = array<i64: 1, 64, 64>}, {transform_indices = @transform_4, window_bounds = array<i64: 1, 4, 16>}, {transform_indices = @transform_5, window_bounds = array<i64: 1, 4, 16>}, {transform_indices = @transform_6, window_bounds = array<i64: 1, 1, 64>}, {transform_indices = @transform_7, window_bounds = array<i64: 1, 1, 64>}, {transform_indices = @transform_8, window_bounds = array<i64: 1, 64, 128>}, {transform_indices = @transform_9, window_bounds = array<i64: 1, 1, 128>}, {transform_indices = @transform_10, window_bounds = array<i64: 1, 128, 64>}, {transform_indices = @transform_11, window_bounds = array<i64: 1, 1, 64>}, {transform_indices = @transform_12, window_bounds = array<i64: 1, 1, 64>}, {transform_indices = @transform_13, window_bounds = array<i64: 1, 1, 64>}, {pipeline_mode = #tpu.pipeline_mode<synchronous>, transform_indices = @transform_14, window_bounds = array<i64: 64, 32>}, {pipeline_mode = #tpu.pipeline_mode<synchronous>, transform_indices = @transform_15, window_bounds = array<i64: 1, 32>}, {pipeline_mode = #tpu.pipeline_mode<synchronous>, transform_indices = @transform_16, window_bounds = array<i64: 1, 32>}, {pipeline_mode = #tpu.pipeline_mode<synchronous>, transform_indices = @transform_17, window_bounds = array<i64: 1, 32>}, {pipeline_mode = #tpu.pipeline_mode<synchronous>, transform_indices = @transform_18, window_bounds = array<i64: 32, 128>}, {pipeline_mode = #tpu.pipeline_mode<synchronous>, transform_indices = @transform_19, window_bounds = array<i64: 1, 128>}, {pipeline_mode = #tpu.pipeline_mode<synchronous>, transform_indices = @transform_20, window_bounds = array<i64: 64, 128>}, {pipeline_mode = #tpu.pipeline_mode<synchronous>, transform_indices = @transform_21, window_bounds = array<i64: 1, 128>}, {transform_indices = @transform_22, window_bounds = array<i64: 16, 256>}]} {
    %c0_i32 = arith.constant 0 : i32
    %0 = arith.cmpi eq, %arg1, %c0_i32 : i32
    %1 = arith.extui %0 : i1 to i32
    %c0_i32_0 = arith.constant 0 : i32
    %2 = arith.cmpi ne, %1, %c0_i32_0 : i32
    scf.if %2 {
      %c0_117 = arith.constant 0 : index
      %c0_118 = arith.constant 0 : index
      %388 = vector.load %arg2[%c0_117, %c0_118] : memref<16x64xf32, #tpu.memory_space<vmem>>, vector<16x64xf32>
      %c0_119 = arith.constant 0 : index
      %c0_120 = arith.constant 0 : index
      %389 = vector.load %arg25[%c0_119, %c0_120] : memref<16x64xf32, #tpu.memory_space<vmem>>, vector<16x64xf32>
      tpu.vector_store %arg25[%c0_119, %c0_120], %388 {strides = array<i32>} : memref<16x64xf32, #tpu.memory_space<vmem>>, vector<16x64xf32>,
    } else {
    }
    %c0 = arith.constant 0 : index
    %c0_1 = arith.constant 0 : index
    %3 = vector.load %arg25[%c0, %c0_1] : memref<16x64xf32, #tpu.memory_space<vmem>>, vector<16x64xf32>
    %4 = arith.truncf %3 : vector<16x64xf32> to vector<16x64xbf16>
    %c0_2 = arith.constant 0 : index
    %c0_3 = arith.constant 0 : index
    %c0_4 = arith.constant 0 : index
    %5 = vector.load %arg4[%c0_2, %c0_3, %c0_4] : memref<1x64x192xbf16, #tpu.memory_space<vmem>>, vector<1x64x192xbf16>
    %6 = vector.shape_cast %5 : vector<1x64x192xbf16> to vector<64x192xbf16>
    %cst = arith.constant dense<0.000000e+00> : vector<16x192xf32>
    %7 = tpu.matmul %4, %6, %cst {dimension_numbers = #tpu.dot_dimension_numbers<[1], [0], [0], [1], [0, 0, 1, 1], [], []>} : vector<16x64xbf16>, vector<64x192xbf16>, vector<16x192xf32> -> vector<16x192xf32>
    %c0_5 = arith.constant 0 : index
    %c0_6 = arith.constant 0 : index
    %c0_7 = arith.constant 0 : index
    %8 = vector.load %arg3[%c0_5, %c0_6, %c0_7] : memref<1x16x64xbf16, #tpu.memory_space<vmem>>, vector<1x16x64xbf16>
    %9 = vector.shape_cast %8 : vector<1x16x64xbf16> to vector<16x64xbf16>
    %c0_8 = arith.constant 0 : index
    %c0_9 = arith.constant 0 : index
    %c0_10 = arith.constant 0 : index
    %10 = vector.load %arg6[%c0_8, %c0_9, %c0_10] : memref<1x4x16xf32, #tpu.memory_space<vmem>>, vector<1x4x16xf32>
    %11 = vector.shape_cast %10 : vector<1x4x16xf32> to vector<4x16xf32>
    %c0_11 = arith.constant 0 : index
    %c0_12 = arith.constant 0 : index
    %c0_13 = arith.constant 0 : index
    %12 = vector.load %arg7[%c0_11, %c0_12, %c0_13] : memref<1x4x16xf32, #tpu.memory_space<vmem>>, vector<1x4x16xf32>
    %13 = vector.shape_cast %12 : vector<1x4x16xf32> to vector<4x16xf32>
    %14 = vector.extract_strided_slice %7 {offsets = [0, 0], sizes = [16, 16], strides = [1, 1]} : vector<16x192xf32> to vector<16x16xf32>
    %15 = vector.extract_strided_slice %7 {offsets = [0, 64], sizes = [16, 16], strides = [1, 1]} : vector<16x192xf32> to vector<16x16xf32>
    %16 = vector.shape_cast %15 : vector<16x16xf32> to vector<2x8x16xf32>
    %17 = arith.truncf %16 : vector<2x8x16xf32> to vector<2x8x16xbf16>
    %18 = vector.extract_strided_slice %7 {offsets = [0, 128], sizes = [16, 16], strides = [1, 1]} : vector<16x192xf32> to vector<16x16xf32>
    %19 = vector.shape_cast %18 : vector<16x16xf32> to vector<2x8x16xf32>
    %20 = arith.truncf %19 : vector<2x8x16xf32> to vector<2x8x16xbf16>
    %21 = vector.extract_strided_slice %9 {offsets = [0, 0], sizes = [16, 16], strides = [1, 1]} : vector<16x64xbf16> to vector<16x16xbf16>
    %22 = vector.extract_strided_slice %11 {offsets = [0, 0], sizes = [1, 16], strides = [1, 1]} : vector<4x16xf32> to vector<1x16xf32>
    %23 = vector.broadcast %22 : vector<1x16xf32> to vector<16x16xf32>
    %24 = arith.addf %14, %23 : vector<16x16xf32>
    %25 = vector.shape_cast %24 : vector<16x16xf32> to vector<2x8x16xf32>
    %26 = arith.truncf %25 : vector<2x8x16xf32> to vector<2x8x16xbf16>
    %27 = vector.extract_strided_slice %13 {offsets = [0, 0], sizes = [1, 16], strides = [1, 1]} : vector<4x16xf32> to vector<1x16xf32>
    %28 = vector.broadcast %27 : vector<1x16xf32> to vector<16x16xf32>
    %29 = arith.addf %14, %28 : vector<16x16xf32>
    %30 = arith.truncf %29 : vector<16x16xf32> to vector<16x16xbf16>
    "tpu.trace_start"() <{level = 10 : i32, message = "bid,bjd->bij"}> : () -> ()
    %cst_14 = arith.constant dense<0.000000e+00> : vector<2x8x8xf32>
    %31 = tpu.matmul %26, %17, %cst_14 {dimension_numbers = #tpu.dot_dimension_numbers<[2], [2], [1], [1], [0, 0, 0, 1, 1, 1], [0], [0]>} : vector<2x8x16xbf16>, vector<2x8x16xbf16>, vector<2x8x8xf32> -> vector<2x8x8xf32>
    "tpu.trace_stop"() : () -> ()
    %cst_15 = arith.constant dense<0.000000e+00> : vector<16x16xf32>
    %32 = tpu.matmul %30, %21, %cst_15 {dimension_numbers = #tpu.dot_dimension_numbers<[1], [1], [0], [0], [0, 0, 1, 0], [], []>} : vector<16x16xbf16>, vector<16x16xbf16>, vector<16x16xf32> -> vector<16x16xf32>
    %33 = vector.shape_cast %32 : vector<16x16xf32> to vector<2x8x16xf32>
    %34 = vector.extract_strided_slice %33 {offsets = [0, 0, 8], sizes = [2, 8, 8], strides = [1, 1, 1]} : vector<2x8x16xf32> to vector<2x8x8xf32>
    %35 = vector.extract_strided_slice %33 {offsets = [0, 0, 0], sizes = [2, 8, 8], strides = [1, 1, 1]} : vector<2x8x16xf32> to vector<2x8x8xf32>
    %36 = tpu.concatenate %34, %35 in 2 : vector<2x8x8xf32>, vector<2x8x8xf32> -> vector<2x8x16xf32>
    %37 = tpu.iota {dimensions = array<i32: 1>} : vector<2x8x16xi32>
    %38 = vector.extract_strided_slice %36 {offsets = [0, 0, 15], sizes = [2, 8, 1], strides = [1, 1, 1]} : vector<2x8x16xf32> to vector<2x8x1xf32>
    %39 = vector.extract_strided_slice %36 {offsets = [0, 0, 0], sizes = [2, 8, 15], strides = [1, 1, 1]} : vector<2x8x16xf32> to vector<2x8x15xf32>
    %40 = tpu.concatenate %38, %39 in 2 : vector<2x8x1xf32>, vector<2x8x15xf32> -> vector<2x8x16xf32>
    %c1_i32 = arith.constant 1 : i32
    %41 = vector.broadcast %c1_i32 : i32 to vector<2x8x16xi32>
    %42 = arith.andi %37, %41 : vector<2x8x16xi32>
    %c0_i32_16 = arith.constant 0 : i32
    %43 = vector.broadcast %c0_i32_16 : i32 to vector<2x8x16xi32>
    %44 = arith.cmpi ne, %42, %43 : vector<2x8x16xi32>
    %45 = arith.select %44, %40, %36 : vector<2x8x16xi1>, vector<2x8x16xf32>
    %46 = vector.extract_strided_slice %45 {offsets = [0, 0, 14], sizes = [2, 8, 2], strides = [1, 1, 1]} : vector<2x8x16xf32> to vector<2x8x2xf32>
    %47 = vector.extract_strided_slice %45 {offsets = [0, 0, 0], sizes = [2, 8, 14], strides = [1, 1, 1]} : vector<2x8x16xf32> to vector<2x8x14xf32>
    %48 = tpu.concatenate %46, %47 in 2 : vector<2x8x2xf32>, vector<2x8x14xf32> -> vector<2x8x16xf32>
    %c2_i32 = arith.constant 2 : i32
    %49 = vector.broadcast %c2_i32 : i32 to vector<2x8x16xi32>
    %50 = arith.andi %37, %49 : vector<2x8x16xi32>
    %c0_i32_17 = arith.constant 0 : i32
    %51 = vector.broadcast %c0_i32_17 : i32 to vector<2x8x16xi32>
    %52 = arith.cmpi ne, %50, %51 : vector<2x8x16xi32>
    %53 = arith.select %52, %48, %45 : vector<2x8x16xi1>, vector<2x8x16xf32>
    %54 = vector.extract_strided_slice %53 {offsets = [0, 0, 12], sizes = [2, 8, 4], strides = [1, 1, 1]} : vector<2x8x16xf32> to vector<2x8x4xf32>
    %55 = vector.extract_strided_slice %53 {offsets = [0, 0, 0], sizes = [2, 8, 12], strides = [1, 1, 1]} : vector<2x8x16xf32> to vector<2x8x12xf32>
    %56 = tpu.concatenate %54, %55 in 2 : vector<2x8x4xf32>, vector<2x8x12xf32> -> vector<2x8x16xf32>
    %c4_i32 = arith.constant 4 : i32
    %57 = vector.broadcast %c4_i32 : i32 to vector<2x8x16xi32>
    %58 = arith.andi %37, %57 : vector<2x8x16xi32>
    %c0_i32_18 = arith.constant 0 : i32
    %59 = vector.broadcast %c0_i32_18 : i32 to vector<2x8x16xi32>
    %60 = arith.cmpi ne, %58, %59 : vector<2x8x16xi32>
    %61 = arith.select %60, %56, %53 : vector<2x8x16xi1>, vector<2x8x16xf32>
    %62 = vector.extract_strided_slice %61 {offsets = [0, 0, 0], sizes = [2, 8, 8], strides = [1, 1, 1]} : vector<2x8x16xf32> to vector<2x8x8xf32>
    %63 = arith.addf %31, %62 : vector<2x8x8xf32>
    %cst_19 = arith.constant 2.500000e-01 : f32
    %64 = vector.broadcast %cst_19 : f32 to vector<2x8x8xf32>
    %65 = arith.mulf %63, %64 : vector<2x8x8xf32>
    %cst_20 = arith.constant dense<0xFF800000> : vector<2x8xf32>
    %66 = vector.multi_reduction <maximumf>, %65, %cst_20 [2] : vector<2x8x8xf32> to vector<2x8xf32>
    %67 = vector.shape_cast %66 : vector<2x8xf32> to vector<2x8x1xf32>
    %68 = vector.broadcast %67 : vector<2x8x1xf32> to vector<2x8x8xf32>
    %69 = arith.subf %65, %68 : vector<2x8x8xf32>
    %70 = math.exp %69 : vector<2x8x8xf32>
    %cst_21 = arith.constant dense<0.000000e+00> : vector<2x8xf32>
    %71 = vector.multi_reduction <add>, %70, %cst_21 [2] : vector<2x8x8xf32> to vector<2x8xf32>
    %72 = vector.shape_cast %71 : vector<2x8xf32> to vector<2x8x1xf32>
    %73 = tpu.reciprocal %72 {approx = true} : vector<2x8x1xf32> -> vector<2x8x1xf32>
    %74 = vector.broadcast %73 : vector<2x8x1xf32> to vector<2x8x8xf32>
    %75 = arith.mulf %70, %74 : vector<2x8x8xf32>
    %76 = arith.truncf %75 : vector<2x8x8xf32> to vector<2x8x8xbf16>
    "tpu.trace_start"() <{level = 10 : i32, message = "bij,bjd->bid"}> : () -> ()
    %cst_22 = arith.constant dense<0.000000e+00> : vector<2x8x16xf32>
    %77 = tpu.matmul %76, %20, %cst_22 {dimension_numbers = #tpu.dot_dimension_numbers<[2], [1], [1], [2], [0, 0, 0, 1, 1, 2], [0], [0]>} : vector<2x8x8xbf16>, vector<2x8x16xbf16>, vector<2x8x16xf32> -> vector<2x8x16xf32>
    "tpu.trace_stop"() : () -> ()
    %78 = vector.shape_cast %77 : vector<2x8x16xf32> to vector<16x16xf32>
    %79 = vector.extract_strided_slice %7 {offsets = [0, 16], sizes = [16, 16], strides = [1, 1]} : vector<16x192xf32> to vector<16x16xf32>
    %80 = vector.extract_strided_slice %7 {offsets = [0, 80], sizes = [16, 16], strides = [1, 1]} : vector<16x192xf32> to vector<16x16xf32>
    %81 = vector.shape_cast %80 : vector<16x16xf32> to vector<2x8x16xf32>
    %82 = arith.truncf %81 : vector<2x8x16xf32> to vector<2x8x16xbf16>
    %83 = vector.extract_strided_slice %7 {offsets = [0, 144], sizes = [16, 16], strides = [1, 1]} : vector<16x192xf32> to vector<16x16xf32>
    %84 = vector.shape_cast %83 : vector<16x16xf32> to vector<2x8x16xf32>
    %85 = arith.truncf %84 : vector<2x8x16xf32> to vector<2x8x16xbf16>
    %86 = vector.extract_strided_slice %9 {offsets = [0, 16], sizes = [16, 16], strides = [1, 1]} : vector<16x64xbf16> to vector<16x16xbf16>
    %87 = vector.extract_strided_slice %11 {offsets = [1, 0], sizes = [1, 16], strides = [1, 1]} : vector<4x16xf32> to vector<1x16xf32>
    %88 = vector.broadcast %87 : vector<1x16xf32> to vector<16x16xf32>
    %89 = arith.addf %79, %88 : vector<16x16xf32>
    %90 = vector.shape_cast %89 : vector<16x16xf32> to vector<2x8x16xf32>
    %91 = arith.truncf %90 : vector<2x8x16xf32> to vector<2x8x16xbf16>
    %92 = vector.extract_strided_slice %13 {offsets = [1, 0], sizes = [1, 16], strides = [1, 1]} : vector<4x16xf32> to vector<1x16xf32>
    %93 = vector.broadcast %92 : vector<1x16xf32> to vector<16x16xf32>
    %94 = arith.addf %79, %93 : vector<16x16xf32>
    %95 = arith.truncf %94 : vector<16x16xf32> to vector<16x16xbf16>
    "tpu.trace_start"() <{level = 10 : i32, message = "bid,bjd->bij"}> : () -> ()
    %cst_23 = arith.constant dense<0.000000e+00> : vector<2x8x8xf32>
    %96 = tpu.matmul %91, %82, %cst_23 {dimension_numbers = #tpu.dot_dimension_numbers<[2], [2], [1], [1], [0, 0, 0, 1, 1, 1], [0], [0]>} : vector<2x8x16xbf16>, vector<2x8x16xbf16>, vector<2x8x8xf32> -> vector<2x8x8xf32>
    "tpu.trace_stop"() : () -> ()
    %cst_24 = arith.constant dense<0.000000e+00> : vector<16x16xf32>
    %97 = tpu.matmul %95, %86, %cst_24 {dimension_numbers = #tpu.dot_dimension_numbers<[1], [1], [0], [0], [0, 0, 1, 0], [], []>} : vector<16x16xbf16>, vector<16x16xbf16>, vector<16x16xf32> -> vector<16x16xf32>
    %98 = vector.shape_cast %97 : vector<16x16xf32> to vector<2x8x16xf32>
    %99 = vector.extract_strided_slice %98 {offsets = [0, 0, 8], sizes = [2, 8, 8], strides = [1, 1, 1]} : vector<2x8x16xf32> to vector<2x8x8xf32>
    %100 = vector.extract_strided_slice %98 {offsets = [0, 0, 0], sizes = [2, 8, 8], strides = [1, 1, 1]} : vector<2x8x16xf32> to vector<2x8x8xf32>
    %101 = tpu.concatenate %99, %100 in 2 : vector<2x8x8xf32>, vector<2x8x8xf32> -> vector<2x8x16xf32>
    %102 = tpu.iota {dimensions = array<i32: 1>} : vector<2x8x16xi32>
    %103 = vector.extract_strided_slice %101 {offsets = [0, 0, 15], sizes = [2, 8, 1], strides = [1, 1, 1]} : vector<2x8x16xf32> to vector<2x8x1xf32>
    %104 = vector.extract_strided_slice %101 {offsets = [0, 0, 0], sizes = [2, 8, 15], strides = [1, 1, 1]} : vector<2x8x16xf32> to vector<2x8x15xf32>
    %105 = tpu.concatenate %103, %104 in 2 : vector<2x8x1xf32>, vector<2x8x15xf32> -> vector<2x8x16xf32>
    %c1_i32_25 = arith.constant 1 : i32
    %106 = vector.broadcast %c1_i32_25 : i32 to vector<2x8x16xi32>
    %107 = arith.andi %102, %106 : vector<2x8x16xi32>
    %c0_i32_26 = arith.constant 0 : i32
    %108 = vector.broadcast %c0_i32_26 : i32 to vector<2x8x16xi32>
    %109 = arith.cmpi ne, %107, %108 : vector<2x8x16xi32>
    %110 = arith.select %109, %105, %101 : vector<2x8x16xi1>, vector<2x8x16xf32>
    %111 = vector.extract_strided_slice %110 {offsets = [0, 0, 14], sizes = [2, 8, 2], strides = [1, 1, 1]} : vector<2x8x16xf32> to vector<2x8x2xf32>
    %112 = vector.extract_strided_slice %110 {offsets = [0, 0, 0], sizes = [2, 8, 14], strides = [1, 1, 1]} : vector<2x8x16xf32> to vector<2x8x14xf32>
    %113 = tpu.concatenate %111, %112 in 2 : vector<2x8x2xf32>, vector<2x8x14xf32> -> vector<2x8x16xf32>
    %c2_i32_27 = arith.constant 2 : i32
    %114 = vector.broadcast %c2_i32_27 : i32 to vector<2x8x16xi32>
    %115 = arith.andi %102, %114 : vector<2x8x16xi32>
    %c0_i32_28 = arith.constant 0 : i32
    %116 = vector.broadcast %c0_i32_28 : i32 to vector<2x8x16xi32>
    %117 = arith.cmpi ne, %115, %116 : vector<2x8x16xi32>
    %118 = arith.select %117, %113, %110 : vector<2x8x16xi1>, vector<2x8x16xf32>
    %119 = vector.extract_strided_slice %118 {offsets = [0, 0, 12], sizes = [2, 8, 4], strides = [1, 1, 1]} : vector<2x8x16xf32> to vector<2x8x4xf32>
    %120 = vector.extract_strided_slice %118 {offsets = [0, 0, 0], sizes = [2, 8, 12], strides = [1, 1, 1]} : vector<2x8x16xf32> to vector<2x8x12xf32>
    %121 = tpu.concatenate %119, %120 in 2 : vector<2x8x4xf32>, vector<2x8x12xf32> -> vector<2x8x16xf32>
    %c4_i32_29 = arith.constant 4 : i32
    %122 = vector.broadcast %c4_i32_29 : i32 to vector<2x8x16xi32>
    %123 = arith.andi %102, %122 : vector<2x8x16xi32>
    %c0_i32_30 = arith.constant 0 : i32
    %124 = vector.broadcast %c0_i32_30 : i32 to vector<2x8x16xi32>
    %125 = arith.cmpi ne, %123, %124 : vector<2x8x16xi32>
    %126 = arith.select %125, %121, %118 : vector<2x8x16xi1>, vector<2x8x16xf32>
    %127 = vector.extract_strided_slice %126 {offsets = [0, 0, 0], sizes = [2, 8, 8], strides = [1, 1, 1]} : vector<2x8x16xf32> to vector<2x8x8xf32>
    %128 = arith.addf %96, %127 : vector<2x8x8xf32>
    %cst_31 = arith.constant 2.500000e-01 : f32
    %129 = vector.broadcast %cst_31 : f32 to vector<2x8x8xf32>
    %130 = arith.mulf %128, %129 : vector<2x8x8xf32>
    %cst_32 = arith.constant dense<0xFF800000> : vector<2x8xf32>
    %131 = vector.multi_reduction <maximumf>, %130, %cst_32 [2] : vector<2x8x8xf32> to vector<2x8xf32>
    %132 = vector.shape_cast %131 : vector<2x8xf32> to vector<2x8x1xf32>
    %133 = vector.broadcast %132 : vector<2x8x1xf32> to vector<2x8x8xf32>
    %134 = arith.subf %130, %133 : vector<2x8x8xf32>
    %135 = math.exp %134 : vector<2x8x8xf32>
    %cst_33 = arith.constant dense<0.000000e+00> : vector<2x8xf32>
    %136 = vector.multi_reduction <add>, %135, %cst_33 [2] : vector<2x8x8xf32> to vector<2x8xf32>
    %137 = vector.shape_cast %136 : vector<2x8xf32> to vector<2x8x1xf32>
    %138 = tpu.reciprocal %137 {approx = true} : vector<2x8x1xf32> -> vector<2x8x1xf32>
    %139 = vector.broadcast %138 : vector<2x8x1xf32> to vector<2x8x8xf32>
    %140 = arith.mulf %135, %139 : vector<2x8x8xf32>
    %141 = arith.truncf %140 : vector<2x8x8xf32> to vector<2x8x8xbf16>
    "tpu.trace_start"() <{level = 10 : i32, message = "bij,bjd->bid"}> : () -> ()
    %cst_34 = arith.constant dense<0.000000e+00> : vector<2x8x16xf32>
    %142 = tpu.matmul %141, %85, %cst_34 {dimension_numbers = #tpu.dot_dimension_numbers<[2], [1], [1], [2], [0, 0, 0, 1, 1, 2], [0], [0]>} : vector<2x8x8xbf16>, vector<2x8x16xbf16>, vector<2x8x16xf32> -> vector<2x8x16xf32>
    "tpu.trace_stop"() : () -> ()
    %143 = vector.shape_cast %142 : vector<2x8x16xf32> to vector<16x16xf32>
    %144 = vector.extract_strided_slice %7 {offsets = [0, 32], sizes = [16, 16], strides = [1, 1]} : vector<16x192xf32> to vector<16x16xf32>
    %145 = vector.extract_strided_slice %7 {offsets = [0, 96], sizes = [16, 16], strides = [1, 1]} : vector<16x192xf32> to vector<16x16xf32>
    %146 = vector.shape_cast %145 : vector<16x16xf32> to vector<2x8x16xf32>
    %147 = arith.truncf %146 : vector<2x8x16xf32> to vector<2x8x16xbf16>
    %148 = vector.extract_strided_slice %7 {offsets = [0, 160], sizes = [16, 16], strides = [1, 1]} : vector<16x192xf32> to vector<16x16xf32>
    %149 = vector.shape_cast %148 : vector<16x16xf32> to vector<2x8x16xf32>
    %150 = arith.truncf %149 : vector<2x8x16xf32> to vector<2x8x16xbf16>
    %151 = vector.extract_strided_slice %9 {offsets = [0, 32], sizes = [16, 16], strides = [1, 1]} : vector<16x64xbf16> to vector<16x16xbf16>
    %152 = vector.extract_strided_slice %11 {offsets = [2, 0], sizes = [1, 16], strides = [1, 1]} : vector<4x16xf32> to vector<1x16xf32>
    %153 = vector.broadcast %152 : vector<1x16xf32> to vector<16x16xf32>
    %154 = arith.addf %144, %153 : vector<16x16xf32>
    %155 = vector.shape_cast %154 : vector<16x16xf32> to vector<2x8x16xf32>
    %156 = arith.truncf %155 : vector<2x8x16xf32> to vector<2x8x16xbf16>
    %157 = vector.extract_strided_slice %13 {offsets = [2, 0], sizes = [1, 16], strides = [1, 1]} : vector<4x16xf32> to vector<1x16xf32>
    %158 = vector.broadcast %157 : vector<1x16xf32> to vector<16x16xf32>
    %159 = arith.addf %144, %158 : vector<16x16xf32>
    %160 = arith.truncf %159 : vector<16x16xf32> to vector<16x16xbf16>
    "tpu.trace_start"() <{level = 10 : i32, message = "bid,bjd->bij"}> : () -> ()
    %cst_35 = arith.constant dense<0.000000e+00> : vector<2x8x8xf32>
    %161 = tpu.matmul %156, %147, %cst_35 {dimension_numbers = #tpu.dot_dimension_numbers<[2], [2], [1], [1], [0, 0, 0, 1, 1, 1], [0], [0]>} : vector<2x8x16xbf16>, vector<2x8x16xbf16>, vector<2x8x8xf32> -> vector<2x8x8xf32>
    "tpu.trace_stop"() : () -> ()
    %cst_36 = arith.constant dense<0.000000e+00> : vector<16x16xf32>
    %162 = tpu.matmul %160, %151, %cst_36 {dimension_numbers = #tpu.dot_dimension_numbers<[1], [1], [0], [0], [0, 0, 1, 0], [], []>} : vector<16x16xbf16>, vector<16x16xbf16>, vector<16x16xf32> -> vector<16x16xf32>
    %163 = vector.shape_cast %162 : vector<16x16xf32> to vector<2x8x16xf32>
    %164 = vector.extract_strided_slice %163 {offsets = [0, 0, 8], sizes = [2, 8, 8], strides = [1, 1, 1]} : vector<2x8x16xf32> to vector<2x8x8xf32>
    %165 = vector.extract_strided_slice %163 {offsets = [0, 0, 0], sizes = [2, 8, 8], strides = [1, 1, 1]} : vector<2x8x16xf32> to vector<2x8x8xf32>
    %166 = tpu.concatenate %164, %165 in 2 : vector<2x8x8xf32>, vector<2x8x8xf32> -> vector<2x8x16xf32>
    %167 = tpu.iota {dimensions = array<i32: 1>} : vector<2x8x16xi32>
    %168 = vector.extract_strided_slice %166 {offsets = [0, 0, 15], sizes = [2, 8, 1], strides = [1, 1, 1]} : vector<2x8x16xf32> to vector<2x8x1xf32>
    %169 = vector.extract_strided_slice %166 {offsets = [0, 0, 0], sizes = [2, 8, 15], strides = [1, 1, 1]} : vector<2x8x16xf32> to vector<2x8x15xf32>
    %170 = tpu.concatenate %168, %169 in 2 : vector<2x8x1xf32>, vector<2x8x15xf32> -> vector<2x8x16xf32>
    %c1_i32_37 = arith.constant 1 : i32
    %171 = vector.broadcast %c1_i32_37 : i32 to vector<2x8x16xi32>
    %172 = arith.andi %167, %171 : vector<2x8x16xi32>
    %c0_i32_38 = arith.constant 0 : i32
    %173 = vector.broadcast %c0_i32_38 : i32 to vector<2x8x16xi32>
    %174 = arith.cmpi ne, %172, %173 : vector<2x8x16xi32>
    %175 = arith.select %174, %170, %166 : vector<2x8x16xi1>, vector<2x8x16xf32>
    %176 = vector.extract_strided_slice %175 {offsets = [0, 0, 14], sizes = [2, 8, 2], strides = [1, 1, 1]} : vector<2x8x16xf32> to vector<2x8x2xf32>
    %177 = vector.extract_strided_slice %175 {offsets = [0, 0, 0], sizes = [2, 8, 14], strides = [1, 1, 1]} : vector<2x8x16xf32> to vector<2x8x14xf32>
    %178 = tpu.concatenate %176, %177 in 2 : vector<2x8x2xf32>, vector<2x8x14xf32> -> vector<2x8x16xf32>
    %c2_i32_39 = arith.constant 2 : i32
    %179 = vector.broadcast %c2_i32_39 : i32 to vector<2x8x16xi32>
    %180 = arith.andi %167, %179 : vector<2x8x16xi32>
    %c0_i32_40 = arith.constant 0 : i32
    %181 = vector.broadcast %c0_i32_40 : i32 to vector<2x8x16xi32>
    %182 = arith.cmpi ne, %180, %181 : vector<2x8x16xi32>
    %183 = arith.select %182, %178, %175 : vector<2x8x16xi1>, vector<2x8x16xf32>
    %184 = vector.extract_strided_slice %183 {offsets = [0, 0, 12], sizes = [2, 8, 4], strides = [1, 1, 1]} : vector<2x8x16xf32> to vector<2x8x4xf32>
    %185 = vector.extract_strided_slice %183 {offsets = [0, 0, 0], sizes = [2, 8, 12], strides = [1, 1, 1]} : vector<2x8x16xf32> to vector<2x8x12xf32>
    %186 = tpu.concatenate %184, %185 in 2 : vector<2x8x4xf32>, vector<2x8x12xf32> -> vector<2x8x16xf32>
    %c4_i32_41 = arith.constant 4 : i32
    %187 = vector.broadcast %c4_i32_41 : i32 to vector<2x8x16xi32>
    %188 = arith.andi %167, %187 : vector<2x8x16xi32>
    %c0_i32_42 = arith.constant 0 : i32
    %189 = vector.broadcast %c0_i32_42 : i32 to vector<2x8x16xi32>
    %190 = arith.cmpi ne, %188, %189 : vector<2x8x16xi32>
    %191 = arith.select %190, %186, %183 : vector<2x8x16xi1>, vector<2x8x16xf32>
    %192 = vector.extract_strided_slice %191 {offsets = [0, 0, 0], sizes = [2, 8, 8], strides = [1, 1, 1]} : vector<2x8x16xf32> to vector<2x8x8xf32>
    %193 = arith.addf %161, %192 : vector<2x8x8xf32>
    %cst_43 = arith.constant 2.500000e-01 : f32
    %194 = vector.broadcast %cst_43 : f32 to vector<2x8x8xf32>
    %195 = arith.mulf %193, %194 : vector<2x8x8xf32>
    %cst_44 = arith.constant dense<0xFF800000> : vector<2x8xf32>
    %196 = vector.multi_reduction <maximumf>, %195, %cst_44 [2] : vector<2x8x8xf32> to vector<2x8xf32>
    %197 = vector.shape_cast %196 : vector<2x8xf32> to vector<2x8x1xf32>
    %198 = vector.broadcast %197 : vector<2x8x1xf32> to vector<2x8x8xf32>
    %199 = arith.subf %195, %198 : vector<2x8x8xf32>
    %200 = math.exp %199 : vector<2x8x8xf32>
    %cst_45 = arith.constant dense<0.000000e+00> : vector<2x8xf32>
    %201 = vector.multi_reduction <add>, %200, %cst_45 [2] : vector<2x8x8xf32> to vector<2x8xf32>
    %202 = vector.shape_cast %201 : vector<2x8xf32> to vector<2x8x1xf32>
    %203 = tpu.reciprocal %202 {approx = true} : vector<2x8x1xf32> -> vector<2x8x1xf32>
    %204 = vector.broadcast %203 : vector<2x8x1xf32> to vector<2x8x8xf32>
    %205 = arith.mulf %200, %204 : vector<2x8x8xf32>
    %206 = arith.truncf %205 : vector<2x8x8xf32> to vector<2x8x8xbf16>
    "tpu.trace_start"() <{level = 10 : i32, message = "bij,bjd->bid"}> : () -> ()
    %cst_46 = arith.constant dense<0.000000e+00> : vector<2x8x16xf32>
    %207 = tpu.matmul %206, %150, %cst_46 {dimension_numbers = #tpu.dot_dimension_numbers<[2], [1], [1], [2], [0, 0, 0, 1, 1, 2], [0], [0]>} : vector<2x8x8xbf16>, vector<2x8x16xbf16>, vector<2x8x16xf32> -> vector<2x8x16xf32>
    "tpu.trace_stop"() : () -> ()
    %208 = vector.shape_cast %207 : vector<2x8x16xf32> to vector<16x16xf32>
    %209 = vector.extract_strided_slice %7 {offsets = [0, 48], sizes = [16, 16], strides = [1, 1]} : vector<16x192xf32> to vector<16x16xf32>
    %210 = vector.extract_strided_slice %7 {offsets = [0, 112], sizes = [16, 16], strides = [1, 1]} : vector<16x192xf32> to vector<16x16xf32>
    %211 = vector.shape_cast %210 : vector<16x16xf32> to vector<2x8x16xf32>
    %212 = arith.truncf %211 : vector<2x8x16xf32> to vector<2x8x16xbf16>
    %213 = vector.extract_strided_slice %7 {offsets = [0, 176], sizes = [16, 16], strides = [1, 1]} : vector<16x192xf32> to vector<16x16xf32>
    %214 = vector.shape_cast %213 : vector<16x16xf32> to vector<2x8x16xf32>
    %215 = arith.truncf %214 : vector<2x8x16xf32> to vector<2x8x16xbf16>
    %216 = vector.extract_strided_slice %9 {offsets = [0, 48], sizes = [16, 16], strides = [1, 1]} : vector<16x64xbf16> to vector<16x16xbf16>
    %217 = vector.extract_strided_slice %11 {offsets = [3, 0], sizes = [1, 16], strides = [1, 1]} : vector<4x16xf32> to vector<1x16xf32>
    %218 = vector.broadcast %217 : vector<1x16xf32> to vector<16x16xf32>
    %219 = arith.addf %209, %218 : vector<16x16xf32>
    %220 = vector.shape_cast %219 : vector<16x16xf32> to vector<2x8x16xf32>
    %221 = arith.truncf %220 : vector<2x8x16xf32> to vector<2x8x16xbf16>
    %222 = vector.extract_strided_slice %13 {offsets = [3, 0], sizes = [1, 16], strides = [1, 1]} : vector<4x16xf32> to vector<1x16xf32>
    %223 = vector.broadcast %222 : vector<1x16xf32> to vector<16x16xf32>
    %224 = arith.addf %209, %223 : vector<16x16xf32>
    %225 = arith.truncf %224 : vector<16x16xf32> to vector<16x16xbf16>
    "tpu.trace_start"() <{level = 10 : i32, message = "bid,bjd->bij"}> : () -> ()
    %cst_47 = arith.constant dense<0.000000e+00> : vector<2x8x8xf32>
    %226 = tpu.matmul %221, %212, %cst_47 {dimension_numbers = #tpu.dot_dimension_numbers<[2], [2], [1], [1], [0, 0, 0, 1, 1, 1], [0], [0]>} : vector<2x8x16xbf16>, vector<2x8x16xbf16>, vector<2x8x8xf32> -> vector<2x8x8xf32>
    "tpu.trace_stop"() : () -> ()
    %cst_48 = arith.constant dense<0.000000e+00> : vector<16x16xf32>
    %227 = tpu.matmul %225, %216, %cst_48 {dimension_numbers = #tpu.dot_dimension_numbers<[1], [1], [0], [0], [0, 0, 1, 0], [], []>} : vector<16x16xbf16>, vector<16x16xbf16>, vector<16x16xf32> -> vector<16x16xf32>
    %228 = vector.shape_cast %227 : vector<16x16xf32> to vector<2x8x16xf32>
    %229 = vector.extract_strided_slice %228 {offsets = [0, 0, 8], sizes = [2, 8, 8], strides = [1, 1, 1]} : vector<2x8x16xf32> to vector<2x8x8xf32>
    %230 = vector.extract_strided_slice %228 {offsets = [0, 0, 0], sizes = [2, 8, 8], strides = [1, 1, 1]} : vector<2x8x16xf32> to vector<2x8x8xf32>
    %231 = tpu.concatenate %229, %230 in 2 : vector<2x8x8xf32>, vector<2x8x8xf32> -> vector<2x8x16xf32>
    %232 = tpu.iota {dimensions = array<i32: 1>} : vector<2x8x16xi32>
    %233 = vector.extract_strided_slice %231 {offsets = [0, 0, 15], sizes = [2, 8, 1], strides = [1, 1, 1]} : vector<2x8x16xf32> to vector<2x8x1xf32>
    %234 = vector.extract_strided_slice %231 {offsets = [0, 0, 0], sizes = [2, 8, 15], strides = [1, 1, 1]} : vector<2x8x16xf32> to vector<2x8x15xf32>
    %235 = tpu.concatenate %233, %234 in 2 : vector<2x8x1xf32>, vector<2x8x15xf32> -> vector<2x8x16xf32>
    %c1_i32_49 = arith.constant 1 : i32
    %236 = vector.broadcast %c1_i32_49 : i32 to vector<2x8x16xi32>
    %237 = arith.andi %232, %236 : vector<2x8x16xi32>
    %c0_i32_50 = arith.constant 0 : i32
    %238 = vector.broadcast %c0_i32_50 : i32 to vector<2x8x16xi32>
    %239 = arith.cmpi ne, %237, %238 : vector<2x8x16xi32>
    %240 = arith.select %239, %235, %231 : vector<2x8x16xi1>, vector<2x8x16xf32>
    %241 = vector.extract_strided_slice %240 {offsets = [0, 0, 14], sizes = [2, 8, 2], strides = [1, 1, 1]} : vector<2x8x16xf32> to vector<2x8x2xf32>
    %242 = vector.extract_strided_slice %240 {offsets = [0, 0, 0], sizes = [2, 8, 14], strides = [1, 1, 1]} : vector<2x8x16xf32> to vector<2x8x14xf32>
    %243 = tpu.concatenate %241, %242 in 2 : vector<2x8x2xf32>, vector<2x8x14xf32> -> vector<2x8x16xf32>
    %c2_i32_51 = arith.constant 2 : i32
    %244 = vector.broadcast %c2_i32_51 : i32 to vector<2x8x16xi32>
    %245 = arith.andi %232, %244 : vector<2x8x16xi32>
    %c0_i32_52 = arith.constant 0 : i32
    %246 = vector.broadcast %c0_i32_52 : i32 to vector<2x8x16xi32>
    %247 = arith.cmpi ne, %245, %246 : vector<2x8x16xi32>
    %248 = arith.select %247, %243, %240 : vector<2x8x16xi1>, vector<2x8x16xf32>
    %249 = vector.extract_strided_slice %248 {offsets = [0, 0, 12], sizes = [2, 8, 4], strides = [1, 1, 1]} : vector<2x8x16xf32> to vector<2x8x4xf32>
    %250 = vector.extract_strided_slice %248 {offsets = [0, 0, 0], sizes = [2, 8, 12], strides = [1, 1, 1]} : vector<2x8x16xf32> to vector<2x8x12xf32>
    %251 = tpu.concatenate %249, %250 in 2 : vector<2x8x4xf32>, vector<2x8x12xf32> -> vector<2x8x16xf32>
    %c4_i32_53 = arith.constant 4 : i32
    %252 = vector.broadcast %c4_i32_53 : i32 to vector<2x8x16xi32>
    %253 = arith.andi %232, %252 : vector<2x8x16xi32>
    %c0_i32_54 = arith.constant 0 : i32
    %254 = vector.broadcast %c0_i32_54 : i32 to vector<2x8x16xi32>
    %255 = arith.cmpi ne, %253, %254 : vector<2x8x16xi32>
    %256 = arith.select %255, %251, %248 : vector<2x8x16xi1>, vector<2x8x16xf32>
    %257 = vector.extract_strided_slice %256 {offsets = [0, 0, 0], sizes = [2, 8, 8], strides = [1, 1, 1]} : vector<2x8x16xf32> to vector<2x8x8xf32>
    %258 = arith.addf %226, %257 : vector<2x8x8xf32>
    %cst_55 = arith.constant 2.500000e-01 : f32
    %259 = vector.broadcast %cst_55 : f32 to vector<2x8x8xf32>
    %260 = arith.mulf %258, %259 : vector<2x8x8xf32>
    %cst_56 = arith.constant dense<0xFF800000> : vector<2x8xf32>
    %261 = vector.multi_reduction <maximumf>, %260, %cst_56 [2] : vector<2x8x8xf32> to vector<2x8xf32>
    %262 = vector.shape_cast %261 : vector<2x8xf32> to vector<2x8x1xf32>
    %263 = vector.broadcast %262 : vector<2x8x1xf32> to vector<2x8x8xf32>
    %264 = arith.subf %260, %263 : vector<2x8x8xf32>
    %265 = math.exp %264 : vector<2x8x8xf32>
    %cst_57 = arith.constant dense<0.000000e+00> : vector<2x8xf32>
    %266 = vector.multi_reduction <add>, %265, %cst_57 [2] : vector<2x8x8xf32> to vector<2x8xf32>
    %267 = vector.shape_cast %266 : vector<2x8xf32> to vector<2x8x1xf32>
    %268 = tpu.reciprocal %267 {approx = true} : vector<2x8x1xf32> -> vector<2x8x1xf32>
    %269 = vector.broadcast %268 : vector<2x8x1xf32> to vector<2x8x8xf32>
    %270 = arith.mulf %265, %269 : vector<2x8x8xf32>
    %271 = arith.truncf %270 : vector<2x8x8xf32> to vector<2x8x8xbf16>
    "tpu.trace_start"() <{level = 10 : i32, message = "bij,bjd->bid"}> : () -> ()
    %cst_58 = arith.constant dense<0.000000e+00> : vector<2x8x16xf32>
    %272 = tpu.matmul %271, %215, %cst_58 {dimension_numbers = #tpu.dot_dimension_numbers<[2], [1], [1], [2], [0, 0, 0, 1, 1, 2], [0], [0]>} : vector<2x8x8xbf16>, vector<2x8x16xbf16>, vector<2x8x16xf32> -> vector<2x8x16xf32>
    "tpu.trace_stop"() : () -> ()
    %273 = vector.shape_cast %272 : vector<2x8x16xf32> to vector<16x16xf32>
    %274 = tpu.concatenate %78, %143, %208, %273 in 1 : vector<16x16xf32>, vector<16x16xf32>, vector<16x16xf32>, vector<16x16xf32> -> vector<16x64xf32>
    %275 = arith.truncf %274 : vector<16x64xf32> to vector<16x64xbf16>
    %c0_59 = arith.constant 0 : index
    %c0_60 = arith.constant 0 : index
    %c0_61 = arith.constant 0 : index
    %276 = vector.load %arg5[%c0_59, %c0_60, %c0_61] : memref<1x64x64xbf16, #tpu.memory_space<vmem>>, vector<1x64x64xbf16>
    %277 = vector.shape_cast %276 : vector<1x64x64xbf16> to vector<64x64xbf16>
    %cst_62 = arith.constant dense<0.000000e+00> : vector<16x64xf32>
    %278 = tpu.matmul %275, %277, %cst_62 {dimension_numbers = #tpu.dot_dimension_numbers<[1], [0], [0], [1], [0, 0, 1, 1], [], []>} : vector<16x64xbf16>, vector<64x64xbf16>, vector<16x64xf32> -> vector<16x64xf32>
    %279 = arith.addf %278, %3 : vector<16x64xf32>
    %c0_63 = arith.constant 0 : index
    %c0_64 = arith.constant 0 : index
    %c0_65 = arith.constant 0 : index
    %280 = vector.load %arg8[%c0_63, %c0_64, %c0_65] : memref<1x1x64xf32, #tpu.memory_space<vmem>>, vector<1x1x64xf32>
    %281 = vector.shape_cast %280 : vector<1x1x64xf32> to vector<1x64xf32>
    %c0_66 = arith.constant 0 : index
    %c0_67 = arith.constant 0 : index
    %c0_68 = arith.constant 0 : index
    %282 = vector.load %arg9[%c0_66, %c0_67, %c0_68] : memref<1x1x64xf32, #tpu.memory_space<vmem>>, vector<1x1x64xf32>
    %283 = vector.shape_cast %282 : vector<1x1x64xf32> to vector<1x64xf32>
    %cst_69 = arith.constant dense<0.000000e+00> : vector<16xf32>
    %284 = vector.multi_reduction <add>, %279, %cst_69 [1] : vector<16x64xf32> to vector<16xf32>
    %285 = vector.shape_cast %284 : vector<16xf32> to vector<16x1xf32>
    %cst_70 = arith.constant 6.400000e+01 : f32
    %286 = vector.broadcast %cst_70 : f32 to vector<16x1xf32>
    %287 = arith.divf %285, %286 : vector<16x1xf32>
    %288 = vector.broadcast %287 : vector<16x1xf32> to vector<16x64xf32>
    %289 = arith.subf %279, %288 : vector<16x64xf32>
    %290 = arith.mulf %289, %289 : vector<16x64xf32>
    %cst_71 = arith.constant dense<0.000000e+00> : vector<16xf32>
    %291 = vector.multi_reduction <add>, %290, %cst_71 [1] : vector<16x64xf32> to vector<16xf32>
    %292 = vector.shape_cast %291 : vector<16xf32> to vector<16x1xf32>
    %cst_72 = arith.constant 6.400000e+01 : f32
    %293 = vector.broadcast %cst_72 : f32 to vector<16x1xf32>
    %294 = arith.divf %292, %293 : vector<16x1xf32>
    %cst_73 = arith.constant 9.99999996E-13 : f32
    %295 = vector.broadcast %cst_73 : f32 to vector<16x1xf32>
    %296 = arith.addf %294, %295 : vector<16x1xf32>
    %297 = math.rsqrt %296 : vector<16x1xf32>
    %298 = vector.broadcast %297 : vector<16x1xf32> to vector<16x64xf32>
    %299 = arith.mulf %289, %298 : vector<16x64xf32>
    %300 = vector.broadcast %281 : vector<1x64xf32> to vector<16x64xf32>
    %301 = arith.mulf %299, %300 : vector<16x64xf32>
    %302 = vector.broadcast %283 : vector<1x64xf32> to vector<16x64xf32>
    %303 = arith.addf %301, %302 : vector<16x64xf32>
    %304 = arith.truncf %303 : vector<16x64xf32> to vector<16x64xbf16>
    %c0_74 = arith.constant 0 : index
    %c0_75 = arith.constant 0 : index
    %c0_76 = arith.constant 0 : index
    %305 = vector.load %arg10[%c0_74, %c0_75, %c0_76] : memref<1x64x128xbf16, #tpu.memory_space<vmem>>, vector<1x64x128xbf16>
    %306 = vector.shape_cast %305 : vector<1x64x128xbf16> to vector<64x128xbf16>
    %cst_77 = arith.constant dense<0.000000e+00> : vector<16x128xf32>
    %307 = tpu.matmul %304, %306, %cst_77 {dimension_numbers = #tpu.dot_dimension_numbers<[1], [0], [0], [1], [0, 0, 1, 1], [], []>} : vector<16x64xbf16>, vector<64x128xbf16>, vector<16x128xf32> -> vector<16x128xf32>
    %c0_78 = arith.constant 0 : index
    %c0_79 = arith.constant 0 : index
    %c0_80 = arith.constant 0 : index
    %308 = vector.load %arg11[%c0_78, %c0_79, %c0_80] : memref<1x1x128xf32, #tpu.memory_space<vmem>>, vector<1x1x128xf32>
    %309 = vector.shape_cast %308 : vector<1x1x128xf32> to vector<1x128xf32>
    %310 = vector.broadcast %309 : vector<1x128xf32> to vector<16x128xf32>
    %311 = arith.addf %307, %310 : vector<16x128xf32>
    %cst_81 = arith.constant 5.000000e-01 : f32
    %312 = vector.broadcast %cst_81 : f32 to vector<16x128xf32>
    %313 = arith.mulf %312, %311 : vector<16x128xf32>
    %cst_82 = arith.constant 0.707106769 : f32
    %314 = vector.broadcast %cst_82 : f32 to vector<16x128xf32>
    %315 = arith.mulf %311, %314 : vector<16x128xf32>
    %316 = math.absf %315 : vector<16x128xf32>
    %cst_83 = arith.constant 0.327591091 : f32
    %317 = vector.broadcast %cst_83 : f32 to vector<16x128xf32>
    %318 = arith.mulf %317, %316 : vector<16x128xf32>
    %cst_84 = arith.constant 1.000000e+00 : f32
    %319 = vector.broadcast %cst_84 : f32 to vector<16x128xf32>
    %320 = arith.addf %319, %318 : vector<16x128xf32>
    %321 = tpu.reciprocal %320 {approx = true} : vector<16x128xf32> -> vector<16x128xf32>
    %cst_85 = arith.constant 1.06140542 : f32
    %322 = vector.broadcast %cst_85 : f32 to vector<16x128xf32>
    %323 = arith.mulf %322, %321 : vector<16x128xf32>
    %cst_86 = arith.constant -1.45315206 : f32
    %324 = vector.broadcast %cst_86 : f32 to vector<16x128xf32>
    %325 = arith.addf %323, %324 : vector<16x128xf32>
    %326 = arith.mulf %325, %321 : vector<16x128xf32>
    %cst_87 = arith.constant 1.42141378 : f32
    %327 = vector.broadcast %cst_87 : f32 to vector<16x128xf32>
    %328 = arith.addf %326, %327 : vector<16x128xf32>
    %329 = arith.mulf %328, %321 : vector<16x128xf32>
    %cst_88 = arith.constant -0.284496725 : f32
    %330 = vector.broadcast %cst_88 : f32 to vector<16x128xf32>
    %331 = arith.addf %329, %330 : vector<16x128xf32>
    %332 = arith.mulf %331, %321 : vector<16x128xf32>
    %cst_89 = arith.constant 0.254829586 : f32
    %333 = vector.broadcast %cst_89 : f32 to vector<16x128xf32>
    %334 = arith.addf %332, %333 : vector<16x128xf32>
    %335 = arith.mulf %334, %321 : vector<16x128xf32>
    %336 = arith.mulf %316, %316 : vector<16x128xf32>
    %cst_90 = arith.constant 0.000000e+00 : f32
    %337 = vector.broadcast %cst_90 : f32 to vector<16x128xf32>
    %338 = arith.subf %337, %336 : vector<16x128xf32>
    %339 = math.exp %338 : vector<16x128xf32>
    %340 = arith.mulf %335, %339 : vector<16x128xf32>
    %cst_91 = arith.constant 1.000000e+00 : f32
    %341 = vector.broadcast %cst_91 : f32 to vector<16x128xf32>
    %342 = arith.subf %341, %340 : vector<16x128xf32>
    %cst_92 = arith.constant 0.000000e+00 : f32
    %343 = vector.broadcast %cst_92 : f32 to vector<16x128xf32>
    %344 = arith.cmpf oge, %315, %343 : vector<16x128xf32>
    %cst_93 = arith.constant 0.000000e+00 : f32
    %345 = vector.broadcast %cst_93 : f32 to vector<16x128xf32>
    %346 = arith.subf %345, %342 : vector<16x128xf32>
    %347 = arith.select %344, %342, %346 : vector<16x128xi1>, vector<16x128xf32>
    %cst_94 = arith.constant 1.000000e+00 : f32
    %348 = vector.broadcast %cst_94 : f32 to vector<16x128xf32>
    %349 = arith.addf %348, %347 : vector<16x128xf32>
    %350 = arith.mulf %313, %349 : vector<16x128xf32>
    %351 = arith.truncf %350 : vector<16x128xf32> to vector<16x128xbf16>
    %c0_95 = arith.constant 0 : index
    %c0_96 = arith.constant 0 : index
    %c0_97 = arith.constant 0 : index
    %352 = vector.load %arg12[%c0_95, %c0_96, %c0_97] : memref<1x128x64xbf16, #tpu.memory_space<vmem>>, vector<1x128x64xbf16>
    %353 = vector.shape_cast %352 : vector<1x128x64xbf16> to vector<128x64xbf16>
    %cst_98 = arith.constant dense<0.000000e+00> : vector<16x64xf32>
    %354 = tpu.matmul %351, %353, %cst_98 {dimension_numbers = #tpu.dot_dimension_numbers<[1], [0], [0], [1], [0, 0, 1, 1], [], []>} : vector<16x128xbf16>, vector<128x64xbf16>, vector<16x64xf32> -> vector<16x64xf32>
    %c0_99 = arith.constant 0 : index
    %c0_100 = arith.constant 0 : index
    %c0_101 = arith.constant 0 : index
    %355 = vector.load %arg13[%c0_99, %c0_100, %c0_101] : memref<1x1x64xf32, #tpu.memory_space<vmem>>, vector<1x1x64xf32>
    %356 = vector.shape_cast %355 : vector<1x1x64xf32> to vector<1x64xf32>
    %357 = vector.broadcast %356 : vector<1x64xf32> to vector<16x64xf32>
    %358 = arith.addf %354, %357 : vector<16x64xf32>
    %359 = arith.addf %358, %303 : vector<16x64xf32>
    %c0_102 = arith.constant 0 : index
    %c0_103 = arith.constant 0 : index
    %c0_104 = arith.constant 0 : index
    %360 = vector.load %arg14[%c0_102, %c0_103, %c0_104] : memref<1x1x64xf32, #tpu.memory_space<vmem>>, vector<1x1x64xf32>
    %361 = vector.shape_cast %360 : vector<1x1x64xf32> to vector<1x64xf32>
    %c0_105 = arith.constant 0 : index
    %c0_106 = arith.constant 0 : index
    %c0_107 = arith.constant 0 : index
    %362 = vector.load %arg15[%c0_105, %c0_106, %c0_107] : memref<1x1x64xf32, #tpu.memory_space<vmem>>, vector<1x1x64xf32>
    %363 = vector.shape_cast %362 : vector<1x1x64xf32> to vector<1x64xf32>
    %cst_108 = arith.constant dense<0.000000e+00> : vector<16xf32>
    %364 = vector.multi_reduction <add>, %359, %cst_108 [1] : vector<16x64xf32> to vector<16xf32>
    %365 = vector.shape_cast %364 : vector<16xf32> to vector<16x1xf32>
    %cst_109 = arith.constant 6.400000e+01 : f32
    %366 = vector.broadcast %cst_109 : f32 to vector<16x1xf32>
    %367 = arith.divf %365, %366 : vector<16x1xf32>
    %368 = vector.broadcast %367 : vector<16x1xf32> to vector<16x64xf32>
    %369 = arith.subf %359, %368 : vector<16x64xf32>
    %370 = arith.mulf %369, %369 : vector<16x64xf32>
    %cst_110 = arith.constant dense<0.000000e+00> : vector<16xf32>
    %371 = vector.multi_reduction <add>, %370, %cst_110 [1] : vector<16x64xf32> to vector<16xf32>
    %372 = vector.shape_cast %371 : vector<16xf32> to vector<16x1xf32>
    %cst_111 = arith.constant 6.400000e+01 : f32
    %373 = vector.broadcast %cst_111 : f32 to vector<16x1xf32>
    %374 = arith.divf %372, %373 : vector<16x1xf32>
    %cst_112 = arith.constant 9.99999996E-13 : f32
    %375 = vector.broadcast %cst_112 : f32 to vector<16x1xf32>
    %376 = arith.addf %374, %375 : vector<16x1xf32>
    %377 = math.rsqrt %376 : vector<16x1xf32>
    %378 = vector.broadcast %377 : vector<16x1xf32> to vector<16x64xf32>
    %379 = arith.mulf %369, %378 : vector<16x64xf32>
    %380 = vector.broadcast %361 : vector<1x64xf32> to vector<16x64xf32>
    %381 = arith.mulf %379, %380 : vector<16x64xf32>
    %382 = vector.broadcast %363 : vector<1x64xf32> to vector<16x64xf32>
    %383 = arith.addf %381, %382 : vector<16x64xf32>
    %c0_113 = arith.constant 0 : index
    %c0_114 = arith.constant 0 : index
    %384 = vector.load %arg25[%c0_113, %c0_114] : memref<16x64xf32, #tpu.memory_space<vmem>>, vector<16x64xf32>
    tpu.vector_store %arg25[%c0_113, %c0_114], %383 {strides = array<i32>} : memref<16x64xf32, #tpu.memory_space<vmem>>, vector<16x64xf32>,
    %c1_i32_115 = arith.constant 1 : i32
    %385 = arith.cmpi eq, %arg1, %c1_i32_115 : i32
    %386 = arith.extui %385 : i1 to i32
    %c0_i32_116 = arith.constant 0 : i32
    %387 = arith.cmpi ne, %386, %c0_i32_116 : i32
    scf.if %387 {
      %388 = arith.truncf %383 : vector<16x64xf32> to vector<16x64xbf16>
      %c0_117 = arith.constant 0 : index
      %c0_118 = arith.constant 0 : index
      %389 = vector.load %arg16[%c0_117, %c0_118] : memref<64x32xbf16, #tpu.memory_space<vmem>>, vector<64x32xbf16>
      %cst_119 = arith.constant dense<0.000000e+00> : vector<16x32xf32>
      %390 = tpu.matmul %388, %389, %cst_119 {dimension_numbers = #tpu.dot_dimension_numbers<[1], [0], [0], [1], [0, 0, 1, 1], [], []>} : vector<16x64xbf16>, vector<64x32xbf16>, vector<16x32xf32> -> vector<16x32xf32>
      %c0_120 = arith.constant 0 : index
      %c0_121 = arith.constant 0 : index
      %391 = vector.load %arg17[%c0_120, %c0_121] : memref<1x32xf32, #tpu.memory_space<vmem>>, vector<1x32xf32>
      %392 = vector.broadcast %391 : vector<1x32xf32> to vector<16x32xf32>
      %393 = arith.addf %390, %392 : vector<16x32xf32>
      %c0_122 = arith.constant 0 : index
      %c0_123 = arith.constant 0 : index
      %394 = vector.load %arg18[%c0_122, %c0_123] : memref<1x32xf32, #tpu.memory_space<vmem>>, vector<1x32xf32>
      %c0_124 = arith.constant 0 : index
      %c0_125 = arith.constant 0 : index
      %395 = vector.load %arg19[%c0_124, %c0_125] : memref<1x32xf32, #tpu.memory_space<vmem>>, vector<1x32xf32>
      %cst_126 = arith.constant dense<0.000000e+00> : vector<16xf32>
      %396 = vector.multi_reduction <add>, %393, %cst_126 [1] : vector<16x32xf32> to vector<16xf32>
      %397 = vector.shape_cast %396 : vector<16xf32> to vector<16x1xf32>
      %cst_127 = arith.constant 3.200000e+01 : f32
      %398 = vector.broadcast %cst_127 : f32 to vector<16x1xf32>
      %399 = arith.divf %397, %398 : vector<16x1xf32>
      %400 = vector.broadcast %399 : vector<16x1xf32> to vector<16x32xf32>
      %401 = arith.subf %393, %400 : vector<16x32xf32>
      %402 = arith.mulf %401, %401 : vector<16x32xf32>
      %cst_128 = arith.constant dense<0.000000e+00> : vector<16xf32>
      %403 = vector.multi_reduction <add>, %402, %cst_128 [1] : vector<16x32xf32> to vector<16xf32>
      %404 = vector.shape_cast %403 : vector<16xf32> to vector<16x1xf32>
      %cst_129 = arith.constant 3.200000e+01 : f32
      %405 = vector.broadcast %cst_129 : f32 to vector<16x1xf32>
      %406 = arith.divf %404, %405 : vector<16x1xf32>
      %cst_130 = arith.constant 9.99999974E-6 : f32
      %407 = vector.broadcast %cst_130 : f32 to vector<16x1xf32>
      %408 = arith.addf %406, %407 : vector<16x1xf32>
      %409 = math.rsqrt %408 : vector<16x1xf32>
      %410 = vector.broadcast %409 : vector<16x1xf32> to vector<16x32xf32>
      %411 = arith.mulf %401, %410 : vector<16x32xf32>
      %412 = vector.broadcast %394 : vector<1x32xf32> to vector<16x32xf32>
      %413 = arith.mulf %411, %412 : vector<16x32xf32>
      %414 = vector.broadcast %395 : vector<1x32xf32> to vector<16x32xf32>
      %415 = arith.addf %413, %414 : vector<16x32xf32>
      %cst_131 = arith.constant 0.000000e+00 : f32
      %416 = vector.broadcast %cst_131 : f32 to vector<16x32xf32>
      %417 = arith.maximumf %415, %416 : vector<16x32xf32>
      %418 = arith.truncf %417 : vector<16x32xf32> to vector<16x32xbf16>
      %c0_132 = arith.constant 0 : index
      %c0_133 = arith.constant 0 : index
      %419 = vector.load %arg20[%c0_132, %c0_133] : memref<32x128xbf16, #tpu.memory_space<vmem>>, vector<32x128xbf16>
      %cst_134 = arith.constant dense<0.000000e+00> : vector<16x128xf32>
      %420 = tpu.matmul %418, %419, %cst_134 {dimension_numbers = #tpu.dot_dimension_numbers<[1], [0], [0], [1], [0, 0, 1, 1], [], []>} : vector<16x32xbf16>, vector<32x128xbf16>, vector<16x128xf32> -> vector<16x128xf32>
      %c0_135 = arith.constant 0 : index
      %c0_136 = arith.constant 0 : index
      %421 = vector.load %arg21[%c0_135, %c0_136] : memref<1x128xf32, #tpu.memory_space<vmem>>, vector<1x128xf32>
      %422 = vector.broadcast %421 : vector<1x128xf32> to vector<16x128xf32>
      %423 = arith.addf %420, %422 : vector<16x128xf32>
      %424 = arith.truncf %383 : vector<16x64xf32> to vector<16x64xbf16>
      %c0_137 = arith.constant 0 : index
      %c0_138 = arith.constant 0 : index
      %425 = vector.load %arg22[%c0_137, %c0_138] : memref<64x128xbf16, #tpu.memory_space<vmem>>, vector<64x128xbf16>
      %cst_139 = arith.constant dense<0.000000e+00> : vector<16x128xf32>
      %426 = tpu.matmul %424, %425, %cst_139 {dimension_numbers = #tpu.dot_dimension_numbers<[1], [0], [0], [1], [0, 0, 1, 1], [], []>} : vector<16x64xbf16>, vector<64x128xbf16>, vector<16x128xf32> -> vector<16x128xf32>
      %c0_140 = arith.constant 0 : index
      %c0_141 = arith.constant 0 : index
      %427 = vector.load %arg23[%c0_140, %c0_141] : memref<1x128xf32, #tpu.memory_space<vmem>>, vector<1x128xf32>
      %428 = vector.broadcast %427 : vector<1x128xf32> to vector<16x128xf32>
      %429 = arith.addf %426, %428 : vector<16x128xf32>
      %430 = tpu.concatenate %423, %429 in 1 : vector<16x128xf32>, vector<16x128xf32> -> vector<16x256xf32>
      %c0_142 = arith.constant 0 : index
      %c0_143 = arith.constant 0 : index
      %431 = vector.load %arg24[%c0_142, %c0_143] : memref<16x256xf32, #tpu.memory_space<vmem>>, vector<16x256xf32>
      tpu.vector_store %arg24[%c0_142, %c0_143], %430 {strides = array<i32>} : memref<16x256xf32, #tpu.memory_space<vmem>>, vector<16x256xf32>,
    } else {
    }
    return
  }
  func.func @transform_0(%arg0: i32, %arg1: i32) -> (i32, i32) {
    %c0_i32 = arith.constant 0 : i32
    %c0_i32_0 = arith.constant 0 : i32
    return %arg0, %c0_i32 : i32, i32
  }
  func.func @transform_1(%arg0: i32, %arg1: i32) -> (i32, i32, i32) {
    %c0_i32 = arith.constant 0 : i32
    %c0_i32_0 = arith.constant 0 : i32
    %c0_i32_1 = arith.constant 0 : i32
    return %arg1, %c0_i32, %c0_i32_0 : i32, i32, i32
  }
  func.func @transform_2(%arg0: i32, %arg1: i32) -> (i32, i32, i32) {
    %c0_i32 = arith.constant 0 : i32
    %c0_i32_0 = arith.constant 0 : i32
    %c0_i32_1 = arith.constant 0 : i32
    return %arg1, %c0_i32, %c0_i32_0 : i32, i32, i32
  }
  func.func @transform_3(%arg0: i32, %arg1: i32) -> (i32, i32, i32) {
    %c0_i32 = arith.constant 0 : i32
    %c0_i32_0 = arith.constant 0 : i32
    %c0_i32_1 = arith.constant 0 : i32
    return %arg1, %c0_i32, %c0_i32_0 : i32, i32, i32
  }
  func.func @transform_4(%arg0: i32, %arg1: i32) -> (i32, i32, i32) {
    %c0_i32 = arith.constant 0 : i32
    %c0_i32_0 = arith.constant 0 : i32
    %c0_i32_1 = arith.constant 0 : i32
    return %arg1, %c0_i32, %c0_i32_0 : i32, i32, i32
  }
  func.func @transform_5(%arg0: i32, %arg1: i32) -> (i32, i32, i32) {
    %c0_i32 = arith.constant 0 : i32
    %c0_i32_0 = arith.constant 0 : i32
    %c0_i32_1 = arith.constant 0 : i32
    return %arg1, %c0_i32, %c0_i32_0 : i32, i32, i32
  }
  func.func @transform_6(%arg0: i32, %arg1: i32) -> (i32, i32, i32) {
    %c0_i32 = arith.constant 0 : i32
    %c0_i32_0 = arith.constant 0 : i32
    %c0_i32_1 = arith.constant 0 : i32
    return %arg1, %c0_i32, %c0_i32_0 : i32, i32, i32
  }
  func.func @transform_7(%arg0: i32, %arg1: i32) -> (i32, i32, i32) {
    %c0_i32 = arith.constant 0 : i32
    %c0_i32_0 = arith.constant 0 : i32
    %c0_i32_1 = arith.constant 0 : i32
    return %arg1, %c0_i32, %c0_i32_0 : i32, i32, i32
  }
  func.func @transform_8(%arg0: i32, %arg1: i32) -> (i32, i32, i32) {
    %c0_i32 = arith.constant 0 : i32
    %c0_i32_0 = arith.constant 0 : i32
    %c0_i32_1 = arith.constant 0 : i32
    return %arg1, %c0_i32, %c0_i32_0 : i32, i32, i32
  }
  func.func @transform_9(%arg0: i32, %arg1: i32) -> (i32, i32, i32) {
    %c0_i32 = arith.constant 0 : i32
    %c0_i32_0 = arith.constant 0 : i32
    %c0_i32_1 = arith.constant 0 : i32
    return %arg1, %c0_i32, %c0_i32_0 : i32, i32, i32
  }
  func.func @transform_10(%arg0: i32, %arg1: i32) -> (i32, i32, i32) {
    %c0_i32 = arith.constant 0 : i32
    %c0_i32_0 = arith.constant 0 : i32
    %c0_i32_1 = arith.constant 0 : i32
    return %arg1, %c0_i32, %c0_i32_0 : i32, i32, i32
  }
  func.func @transform_11(%arg0: i32, %arg1: i32) -> (i32, i32, i32) {
    %c0_i32 = arith.constant 0 : i32
    %c0_i32_0 = arith.constant 0 : i32
    %c0_i32_1 = arith.constant 0 : i32
    return %arg1, %c0_i32, %c0_i32_0 : i32, i32, i32
  }
  func.func @transform_12(%arg0: i32, %arg1: i32) -> (i32, i32, i32) {
    %c0_i32 = arith.constant 0 : i32
    %c0_i32_0 = arith.constant 0 : i32
    %c0_i32_1 = arith.constant 0 : i32
    return %arg1, %c0_i32, %c0_i32_0 : i32, i32, i32
  }
  func.func @transform_13(%arg0: i32, %arg1: i32) -> (i32, i32, i32) {
    %c0_i32 = arith.constant 0 : i32
    %c0_i32_0 = arith.constant 0 : i32
    %c0_i32_1 = arith.constant 0 : i32
    return %arg1, %c0_i32, %c0_i32_0 : i32, i32, i32
  }
  func.func @transform_14(%arg0: i32, %arg1: i32) -> (i32, i32) {
    %c0_i32 = arith.constant 0 : i32
    %c0_i32_0 = arith.constant 0 : i32
    %c0_i32_1 = arith.constant 0 : i32
    return %c0_i32, %c0_i32_0 : i32, i32
  }
  func.func @transform_15(%arg0: i32, %arg1: i32) -> (i32, i32) {
    %c0_i32 = arith.constant 0 : i32
    %c0_i32_0 = arith.constant 0 : i32
    %c0_i32_1 = arith.constant 0 : i32
    return %c0_i32, %c0_i32_0 : i32, i32
  }
  func.func @transform_16(%arg0: i32, %arg1: i32) -> (i32, i32) {
    %c0_i32 = arith.constant 0 : i32
    %c0_i32_0 = arith.constant 0 : i32
    %c0_i32_1 = arith.constant 0 : i32
    return %c0_i32, %c0_i32_0 : i32, i32
  }
  func.func @transform_17(%arg0: i32, %arg1: i32) -> (i32, i32) {
    %c0_i32 = arith.constant 0 : i32
    %c0_i32_0 = arith.constant 0 : i32
    %c0_i32_1 = arith.constant 0 : i32
    return %c0_i32, %c0_i32_0 : i32, i32
  }
  func.func @transform_18(%arg0: i32, %arg1: i32) -> (i32, i32) {
    %c0_i32 = arith.constant 0 : i32
    %c0_i32_0 = arith.constant 0 : i32
    %c0_i32_1 = arith.constant 0 : i32
    return %c0_i32, %c0_i32_0 : i32, i32
  }
  func.func @transform_19(%arg0: i32, %arg1: i32) -> (i32, i32) {
    %c0_i32 = arith.constant 0 : i32
    %c0_i32_0 = arith.constant 0 : i32
    %c0_i32_1 = arith.constant 0 : i32
    return %c0_i32, %c0_i32_0 : i32, i32
  }
  func.func @transform_20(%arg0: i32, %arg1: i32) -> (i32, i32) {
    %c0_i32 = arith.constant 0 : i32
    %c0_i32_0 = arith.constant 0 : i32
    %c0_i32_1 = arith.constant 0 : i32
    return %c0_i32, %c0_i32_0 : i32, i32
  }
  func.func @transform_21(%arg0: i32, %arg1: i32) -> (i32, i32) {
    %c0_i32 = arith.constant 0 : i32
    %c0_i32_0 = arith.constant 0 : i32
    %c0_i32_1 = arith.constant 0 : i32
    return %c0_i32, %c0_i32_0 : i32, i32
  }
  func.func @transform_22(%arg0: i32, %arg1: i32) -> (i32, i32) {
    %c0_i32 = arith.constant 0 : i32
    %c0_i32_0 = arith.constant 0 : i32
    return %arg0, %c0_i32 : i32, i32
  }
}

</mosaic_0001>

<bundles_post_ra>
// kernel: forward.1
= control target key start
LH: loop header
LB: loop body
LE: loop exit
PB: predicated region body
PF: predicated region fallthrough
CT: control target
= control target key end

     0   :  { %s4135_s28 = smov 0   ;;  %s4137_s29 = smov 0   ;;  %s4837_s0 = inlined_call_operand.vmem [shape: f32[16,64], index: 0, kind: input, shape index: {}]   ;;  %s4838_s1 = inlined_call_operand.vmem [shape: bf16[2,16,64], index: 1, kind: input, shape index: {}]   ;;  %s4839_s2 = inlined_call_operand.vmem [shape: bf16[2,64,192], index: 2, kind: input, shape index: {}]   ;;  %s4840_s3 = inlined_call_operand.vmem [shape: bf16[2,64,64], index: 3, kind: input, shape index: {}]   ;;  %s4841_s4 = inlined_call_operand.vmem [shape: f32[2,4,16], index: 4, kind: input, shape index: {}]   ;;  %s4842_s5 = inlined_call_operand.vmem [shape: f32[2,4,16], index: 5, kind: input, shape index: {}]   ;;  %s4843_s6 = inlined_call_operand.vmem [shape: f32[2,1,64], index: 6, kind: input, shape index: {}]   ;;  %s4844_s7 = inlined_call_operand.vmem [shape: f32[2,1,64], index: 7, kind: input, shape index: {}]   ;;  %s4845_s8 = inlined_call_operand.vmem [shape: bf16[2,64,128], index: 8, kind: input, shape index: {}]   ;;  %s4846_s9 = inlined_call_operand.vmem [shape: f32[2,1,128], index: 9, kind: input, shape index: {}]   ;;  %s4847_s10 = inlined_call_operand.vmem [shape: bf16[2,128,64], index: 10, kind: input, shape index: {}]   ;;  %s4848_s11 = inlined_call_operand.vmem [shape: f32[2,1,64], index: 11, kind: input, shape index: {}]   ;;  %s4849_s12 = inlined_call_operand.vmem [shape: f32[2,1,64], index: 12, kind: input, shape index: {}]   ;;  %s4850_s13 = inlined_call_operand.vmem [shape: f32[2,1,64], index: 13, kind: input, shape index: {}]   ;;  %s4851_s14 = inlined_call_operand.vmem [shape: bf16[64,32], index: 14, kind: input, shape index: {}]   ;;  %s4852_s15 = inlined_call_operand.vmem [shape: f32[1,32], index: 15, kind: input, shape index: {}]   ;;  %s4853_s16 = inlined_call_operand.vmem [shape: f32[1,32], index: 16, kind: input, shape index: {}]   ;;  %s4854_s17 = inlined_call_operand.vmem [shape: f32[1,32], index: 17, kind: input, shape index: {}]   ;;  %s4855_s18 = inlined_call_operand.vmem [shape: bf16[32,128], index: 18, kind: input, shape index: {}]   ;;  %s4856_s19 = inlined_call_operand.vmem [shape: f32[1,128], index: 19, kind: input, shape index: {}]   ;;  %s4857_s20 = inlined_call_operand.vmem [shape: bf16[64,128], index: 20, kind: input, shape index: {}]   ;;  %s4858_s21 = inlined_call_operand.vmem [shape: f32[1,128], index: 21, kind: input, shape index: {}]   ;;  %s4859_s22 = inlined_call_operand.vmem [shape: f32[16,256], index: 22, kind: output, shape index: {}]  }
   0x1   :  { %4868 = sst [smem:[#allocation8_spill]] %s4837_s0 }
   0x2   :  { %4869 = sst [smem:[#allocation9_spill]] %s4838_s1 }
   0x3   :  { %4870 = sst [smem:[#allocation10_spill]] %s4839_s2 }
   0x4   :  { %4871 = sst [smem:[#allocation11_spill]] %s4840_s3  ;;  %s4133_s3 = smov 0  }
   0x5   :  { %4872 = sst [smem:[#allocation12_spill]] %s4841_s4 }
   0x6   :  { %4873 = sst [smem:[#allocation13_spill]] %s4842_s5 }
   0x7   :  { %4874 = sst [smem:[#allocation14_spill]] %s4843_s6 }
   0x8   :  { %4875 = sst [smem:[#allocation15_spill]] %s4851_s14 }
   0x9   :  { %4876 = sst [smem:[#allocation16_spill]] %s4852_s15 }
   0xa   :  { %4877 = sst [smem:[#allocation17_spill]] %s4853_s16 }
   0xb   :  { %4878 = sst [smem:[#allocation18_spill]] %s4854_s17 }
   0xc   :  { %4879 = sst [smem:[#allocation19_spill]] %s4855_s18 }
   0xd   :  { %4880 = sst [smem:[#allocation20_spill]] %s4856_s19 }
   0xe   :  { %4881 = sst [smem:[#allocation21_spill]] %s4857_s20 }
   0xf   :  { %4882 = sst [smem:[#allocation22_spill]] %s4858_s21 }
  0x10   :  { %4883 = sst [smem:[#allocation23_spill]] %s4859_s22 }
  0x11 LB: > { %4884 = sst [smem:[#allocation3_spill]] %s3992_s28  ;;  %s41_s30 = sadd.s32 1, %s3992_s28  ;;  %s3996_s29 = sphi %s4137_s29, %s32_s29   ;;  %s3992_s28 = sphi %s4135_s28, %s4917_s28   ;;  %s3988_s3 = sphi %s4133_s3, %s4916_s3  }
  0x12   : > { %4885 = sst [smem:[#allocation4_spill]] %s3996_s29  ;;  %p3458_p0 = scmp.ge.s32.totalorder %s3996_s29, 1 }
  0x13   : > { %p42_p1 = scmp.ge.s32.totalorder %s41_s30, 2  ;;  %p741_p2 = scmp.lt.s32.totalorder %s3996_s29, 3 }
  0x15   : > { %s4919_s30 = smov (%p42_p1, %s41_s30), 0  ;;  %p742_p3 = pnand %p3458_p0, %p741_p2 }
  0x16   : > { %4886 = sst [smem:[#allocation5_spill]] %s4919_s30 }
  0x17   : > { %745 = sbr.rel (%p742_p3) target bundleno = 6936 (0x1b18), region = 108 }
  0x1e   : > { %p861_p4 = scmp.lt.s32.totalorder %s3988_s3, 1  ;;  %s4887_s24 = sld [smem:[#allocation9_spill]] }
  0x1f   : > { %s4889_s2 = sld [smem:[#allocation10_spill]]  ;;  %s4890_s22 = sld [smem:[#allocation11_spill]] }
  0x20   : > { %s4155_s4 = scalar_select %p861_p4, %s3988_s3, 1 }
  0x21   : > { %s4892_s16 = sld [smem:[#allocation12_spill]]  ;;  %s4893_s5 = sld [smem:[#allocation13_spill]] }
  0x22   : > { %s3549_s0 = sshll.u32 %s4155_s4, 3  ;;  %s3550_s23 = sshll.u32 %s4155_s4, 6 }
  0x23   : > { %s3551_s30 = sshll.u32 %s4155_s4, 5  ;;  %s3465_s28 = sshll.u32 %s4155_s4, 2 }
  0x24   : > { %s4162_s6 = scalar_lea.vmem %s4887_s24, %s3549_s0  ;;  %s889_s21 = scalar_lea.vmem %s4844_s7, %s4155_s4 }
  0x25   : > { %4888 = sst [smem:[#allocation6_spill]] %s4162_s6  ;;  %s4167_s27 = scalar_lea.vmem %s4889_s2, %s3550_s23 }
  0x26   : > { %s4174_s19 = scalar_lea.vmem %s4890_s22, %s3551_s30  ;;  %s4894_s2 = sld [smem:[#allocation14_spill]] }
  0x27   : > { %4891 = sst [smem:[#allocation7_spill]] %s4174_s19  ;;  %s4179_s18 = scalar_lea.vmem %s4892_s16, %s3465_s28 }
  0x28   : > { %s4184_s24 = scalar_lea.vmem %s4893_s5, %s3465_s28  ;;  %s4197_s19 = scalar_lea.vmem %s4845_s8, %s3551_s30 }
  0x29   : > { %s897_s20 = scalar_lea.vmem %s4846_s9, %s4155_s4  ;;  %s4206_s0 = scalar_lea.vmem %s4847_s10, %s3550_s23 }
  0x2a   : > { %s905_s26 = scalar_lea.vmem %s4848_s11, %s4155_s4  ;;  %s911_s29 = scalar_lea.vmem %s4850_s13, %s4155_s4 }
  0x2b   : > { %p3471_p5 = scmp.ne.s32.totalorder %s3988_s3, 0 }
  0x2c   : > { %s886_s15 = scalar_lea.vmem %s4894_s2, %s4155_s4  ;;  %s908_s2 = scalar_lea.vmem %s4849_s12, %s4155_s4  ;;  %vm926_vm0 = vcmask (!%p3471_p5), 523264  }
  0x2d   : > { %923 = sbr.rel (%p3471_p5) target bundleno = 53 (0x35), region = 112  ;;  %s4895_s1 = sld [smem:[#allocation8_spill]] (!%p3471_p5) }
  0x33   : > { %v924_v0 = vld [vmem:[%s4895_s1] sm:$0xff] (!%p3471_p5)  ;;  %v925_v1 = vld [vmem:[%s4895_s1 + $0x8] sm:$0xff] (!%p3471_p5) }
  0x34   : > { %927 = vst.msk [vmem:[#allocation2] sm:$0xff] %vm926_vm0, %v924_v0  ;;  %928 = vst.msk [vmem:[#allocation2 + $0x8] sm:$0xff] %vm926_vm0, %v925_v1 }
  0x35 PF: > { %v3881_v2 = vld [vmem:[%s4167_s27 + $0x4] ss:$8 sps:$4 sm:$0xff]   ;;  %v3883_v3 = vld [vmem:[%s4167_s27] ss:$8 sps:$4 sm:$0xff]   ;;  %v3998_v4 = vmov 0   ;;  %v3999_v6 = vmov 0.0   ;;  %v1035_v17 = vlaneseq }
  0x36   : > { %1016 = vmatprep.mubr.bf16.mxu1 %v3998_v4  ;;  %984 = vmatprep.subr.bf16.mxu1 %v3881_v2  ;;  %v3884_v5 = vld [vmem:[%s4167_s27 + $0x14] ss:$8 sps:$4 sm:$0xff]   ;;  %s4896_s5 = sld [smem:[#allocation6_spill]]  ;;  %v3886_v7 = vld [vmem:[%s4167_s27 + $0x10] ss:$8 sps:$4 sm:$0xff]   ;;  %vm980_vm1 = vcmask 523264  }
  0x37   : > { %3638 = vmatprep.subr.bf16.mxu0 %v3999_v6  ;;  %985 = vmatpush1.bf16.msra.mxu1 %v3883_v3  ;;  %v3887_v8 = vld [vmem:[%s4167_s27 + $0x24] ss:$8 sps:$4 sm:$0xff]   ;;  %v3889_v9 = vld [vmem:[%s4167_s27 + $0x20] ss:$8 sps:$4 sm:$0xff]   ;;  %v3890_v10 = vld [vmem:[%s4167_s27 + $0x34] ss:$8 sps:$4 sm:$0xff]  }
  0x38   : > { %986 = vmatprep.subr.bf16.mxu1 %v3884_v5  ;;  %v3892_v11 = vld [vmem:[%s4167_s27 + $0x30] ss:$8 sps:$4 sm:$0xff]   ;;  %vm1055_vm2 = vcmask 130048   ;;  %vm4000_vm3 = vmmov 0   ;;  %v4248_v18 = vshrl.u32 %v1035_v17, 7  ;;  %s4001_s27 = smov 64  }
  0x39   : > { %3640 = vmatprep.mubr.msk.bf16.mxu0 %vm4000_vm3, %v3999_v6  ;;  %v4252_v20 = vld [vmem:[%s4179_s18] sm:$0xf]  ;;  %vm1312_vm4 = vcmask 1043456   ;;  %s4002_s18 = smov 8   ;;  %vm1117_vm5 = vcmask 64512   ;;  %s4004_s25 = smov 1  }
  0x3a   : > { %v1037_v19 = vsub.s32 0, %v4248_v18  ;;  %v4255_v21 = vld [vmem:[%s4184_s24] sm:$0xf]  ;;  %s4003_s24 = smov 120   ;;  %s4005_s14 = smov 113   ;;  %v1139_v50 = vand.u32 1, %v4248_v18 }
  0x3b   : > { %987 = vmatpush1.bf16.msra.mxu1 %v3886_v7  ;;  %v929_v12 = vld [vmem:[#allocation2] sm:$0xff]  ;;  %v930_v13 = vld [vmem:[#allocation2 + $0x8] sm:$0xff]  ;;  %vm1136_vm6 = vcmask 7168   ;;  %s4006_s6 = smov 2   ;;  %s4007_s22 = smov 114   ;;  %v1160_v56 = vand.u32 2, %v4248_v18 }
  0x3c   : > { %988 = vmatprep.subr.bf16.mxu1 %v3887_v8  ;;  %v931_v14 = vpack.c.bf16 %v930_v13, %v929_v12  ;;  %v4237_v15 = vld [vmem:[%s4896_s5] sm:$0xff]   ;;  %v1038_v22 = vrot.slane %v4252_v20, %v1037_v19  ;;  %v1046_v23 = vrot.slane %v4255_v21, %v1037_v19  ;;  %vm4296_vm7 = vcmp.ne.s32.totalorder %v1139_v50, 0  ;;  %s4008_s30 = smov 4   ;;  %s4009_s16 = smov 116  }
  0x3d   : > { %v1060_v16 = vsel %vm1055_vm2, %v4237_v15, 0  ;;  %vm1157_vm8 = vcmask 15360   ;;  %vm4306_vm9 = vcmp.ne.s32.totalorder %v1160_v56, 0  ;;  %v1181_v63 = vand.u32 4, %v4248_v18  ;;  %s4010_s17 = smov 16   ;;  %s4011_s23 = smov 112  }
  0x3e   : > { %vm1178_vm10 = vcmask 31744   ;;  %s4012_s28 = smov 48   ;;  %s4013_s5 = smov 32   ;;  %vm2537_vm12 = vcmask 261120   ;;  %vm2540_vm13 = vcmask 392192  }
  0x3f   : > { %989 = vmatpush1.bf16.msra.mxu1 %v3889_v9  ;;  %vm4324_vm11 = vcmp.ne.s32.totalorder %v1181_v63, 0  ;;  %p3526_p6 = scmp.ne.s32.totalorder %s3988_s3, 1 }
  0x40   : > { %990 = vmatprep.subr.bf16.mxu1 %v3890_v10  ;;  %vm4017_vm0 = vmmov (!%p3526_p6), 0   ;;  %s4911_s4 = sld [smem:[#allocation21_spill]] (!%p3526_p6) }
  0x43   : > { %991 = vmatpush1.bf16.msra.mxu1 %v3892_v11 }
  0x44   : > { %3626 = vmatprep.subr.bf16.mxu1 %v3999_v6 }
  0x46   : > { %3480 = vmatmul.mubr.msk.bf16.vlgmr.msra.gmra.mrb[0].mxu1 %vm980_vm1, %v931_v14 }
  0x47   : > { %3628 = vmatprep.mubr.msk.bf16.mxu1 %vm4000_vm3, %v3999_v6 }
  0x4c   : > { %3627 = vmatpush3.bf16.xpose.msra.mxu1 %v1060_v16  ;;  %v1404_v16 = vsub.s32 1, %v4248_v18 }
  0x4d   : > { %3632 = vmatprep.subr.bf16.mxu1 %v3999_v6 }
  0x4e   : > { %v1405_v50 = vrot.slane %v4252_v20, %v1404_v16 }
 0x119   : > { %v4259_v24 = vpop.f32.mrb[0].mxu1 }
 0x11a   : > { %v1020_v25 = vpop.f32.mrb[1].mxu1  ;;  %v4263_v26 = vpack.c.bf16 %v4259_v24, %v4259_v24  ;;  %v1039_v27 = vadd.f32 %v1038_v22, %v4259_v24  ;;  %v1047_v30 = vadd.f32 %v1046_v23, %v4259_v24 }
 0x11b   : > { %v4266_v28 = vpop.f32.mrb[2].mxu1  ;;  %v4282_v36 = vpack.c.bf16 %v1020_v25, %v1020_v25 }
 0x11c   : > { %1186 = vrot.lane.b32.xlu0 %v4263_v26, %s4001_s27  ;;  %v4270_v29 = vpop.f32.mrb[3].mxu1  ;;  %v1048_v31 = vadd.f32 %v1046_v23, %v4266_v28  ;;  %v4275_v32 = vadd.f32 %v1038_v22, %v4266_v28  ;;  %v1041_v37 = vpack.c.bf16 %v1039_v27, %v1039_v27  ;;  %v4317_v62 = vpack.c.bf16 %v4266_v28, %v4266_v28 }
 0x11d   : > { %v1314_v38 = vsel %vm1312_vm4, %v4282_v36, 0  ;;  %v4336_v13 = vpack.c.bf16 %v4270_v29, %v4270_v29  ;;  %v1417_v22 = vrot.slane %v4255_v21, %v1404_v16 }
 0x11e   : > { %v1049_v33 = vpack.c.bf16 %v1048_v31, %v1047_v30  ;;  %v1042_v17 = vpack.c.bf16 %v4275_v32, %v4275_v32 }
 0x11f   : > { %v1360_v19 = vsel %vm1312_vm4, %v4336_v13, 0 }
 0x120   : > { %3629 = vmatmul.mubr.msk.bf16.vlgmr.msra.gmra.mrb[4].mxu1 %vm1055_vm2, %v1049_v33 }
 0x121   : > { %3634 = vmatprep.mubr.msk.bf16.mxu1 %vm4000_vm3, %v3999_v6 }
 0x18e   : > { %v1187_v34 = vpop.permute.xlu0 %1186 }
 0x18f   : > { %v1192_v35 = vsel %vm1055_vm2, %v1187_v34, 0 }
 0x190   : > { %3633 = vmatpush3.bf16.xpose.msra.mxu1 %v1192_v35 }
 0x191   : > { %3644 = vmatprep.subr.bf16.mxu1 %v3999_v6 }
 0x197   : > { %3635 = vmatmul.mubr.msk.bf16.vlgmr.msra.gmra.mrb[8].mxu1 %vm1055_vm2, %v1041_v37 }
 0x198   : > { %3645 = vmatpush3.bf16.msra.mxu1 %v1314_v38  ;;  %3646 = vmatprep.mubr.msk.bf16.mxu1 %vm4000_vm3, %v3999_v6 }
 0x199   : > { %3656 = vmatprep.subr.bf16.mxu1 %v3999_v6 }
 0x1f3   : > { %v1096_v39 = vpop.f32.mrb[4].mxu1 }
 0x1f4   : > { %1111 = vrot.lane.b32.xlu1 %v1096_v39, %s4002_s18  ;;  %1105 = vrot.lane.b32.xlu0 %v1096_v39, %s4003_s24  ;;  %v3630_v40 = vpop.f32.mrb[5].mxu1 }
 0x1f5   : > { %v1099_v41 = vpop.f32.mrb[6].mxu1 }
 0x1f6   : > { %v3631_v42 = vpop.f32.mrb[7].mxu1 }
 0x266   : > { %v1112_v43 = vpop.permute.xlu1 %1111  ;;  %v1106_v44 = vpop.permute.xlu0 %1105 }
 0x267   : > { %v1118_v45 = vsel %vm1117_vm5, %v1106_v44, %v1112_v43 }
 0x268   : > { %1130 = vrot.lane.b32.xlu0 %v1118_v45, %s4004_s25  ;;  %1124 = vrot.lane.b32.xlu1 %v1118_v45, %s4005_s14 }
 0x26a   : > { %v1228_v46 = vpop.f32.mrb[8].mxu1 }
 0x26b   : > { %v3636_v47 = vpop.f32.mrb[9].mxu1 }
 0x26c   : > { %v1231_v48 = vpop.f32.mrb[10].mxu1 }
 0x26d   : > { %v3637_v49 = vpop.f32.mrb[11].mxu1 }
 0x2da   : > { %v1131_v52 = vpop.permute.xlu0 %1130  ;;  %v1125_v53 = vpop.permute.xlu1 %1124 }
 0x2db   : > { %v1137_v54 = vsel %vm1136_vm6, %v1125_v53, %v1131_v52 }
 0x2dc   : > { %v1141_v55 = vsel %vm4296_vm7, %v1137_v54, %v1118_v45 }
 0x2dd   : > { %1151 = vrot.lane.b32.xlu0 %v1141_v55, %s4006_s6  ;;  %1145 = vrot.lane.b32.xlu1 %v1141_v55, %s4007_s22 }
 0x34f   : > { %v1152_v58 = vpop.permute.xlu0 %1151  ;;  %v1146_v59 = vpop.permute.xlu1 %1145 }
 0x350   : > { %v1158_v60 = vsel %vm1157_vm8, %v1146_v59, %v1152_v58 }
 0x351   : > { %v1162_v61 = vsel %vm4306_vm9, %v1158_v60, %v1141_v55 }
 0x352   : > { %1172 = vrot.lane.b32.xlu0 %v1162_v61, %s4008_s30  ;;  %1166 = vrot.lane.b32.xlu1 %v1162_v61, %s4009_s16 }
 0x356   : > { %1235 = vrot.lane.b32.xlu1 %v4317_v62, %s4001_s27  ;;  %1107 = vrot.lane.b32.xlu0 %v1099_v41, %s4003_s24  ;;  %s4014_s27 = smov 96  }
 0x35a   : > { %1113 = vrot.lane.b32.xlu1 %v1099_v41, %s4002_s18 }
 0x3c4   : > { %v1173_v1 = vpop.permute.xlu0 %1172  ;;  %v1167_v2 = vpop.permute.xlu1 %1166 }
 0x3c5   : > { %v1179_v3 = vsel %vm1178_vm10, %v1167_v2, %v1173_v1 }
 0x3c6   : > { %v1183_v4 = vsel %vm4324_vm11, %v1179_v3, %v1162_v61 }
 0x3c7   : > { %v1229_v5 = vadd.f32 %v1228_v46, %v1183_v4 }
 0x3c8   : > { %v1236_v7 = vpop.permute.xlu1 %1235  ;;  %v1108_v11 = vpop.permute.xlu0 %1107 }
 0x3c9   : > { %v1241_v8 = vsel %vm1055_vm2, %v1236_v7, 0  ;;  %v1283_v9 = vmul.f32 0.25, %v1229_v5 }
 0x3ca   : > { %3639 = vmatpush3.bf16.xpose.msra.mxu0 %v1241_v8 }
 0x3cb   : > { %v1285_v10 = vsel %vm1117_vm5, %v1283_v9, -inf  ;;  %3650 = vmatprep.subr.bf16.mxu0 %v3999_v6 }
 0x3cc   : > { %v1114_v12 = vpop.permute.xlu1 %1113  ;;  %1286 = vmax.xlane.f32.xlu0 %v1285_v10 }
 0x3cd   : > { %v1119_v14 = vsel %vm1117_vm5, %v1108_v11, %v1114_v12 }
 0x3ce   : > { %1126 = vrot.lane.b32.xlu1 %v1119_v14, %s4005_s14 }
 0x3d1   : > { %3641 = vmatmul.mubr.msk.bf16.vlgmr.msra.gmra.mrb[0].mxu0 %vm1055_vm2, %v1042_v17 }
 0x3d2   : > { %1132 = vrot.lane.b32.xlu1 %v1119_v14, %s4004_s25  ;;  %3651 = vmatpush3.bf16.msra.mxu0 %v1360_v19 }
 0x3d3   : > { %3652 = vmatprep.mubr.msk.bf16.mxu0 %vm4000_vm3, %v3999_v6  ;;  %3662 = vmatprep.subr.bf16.mxu0 %v3999_v6 }
 0x3d6   : > { %1419 = vrot.lane.b32.xlu1 %v1417_v22, %s4010_s17 }
 0x440   : > { %v1127_v23 = vpop.permute.xlu1 %1126 }
 0x444   : > { %v1133_v25 = vpop.permute.xlu1 %1132 }
 0x445   : > { %v1138_v27 = vsel %vm1136_vm6, %v1127_v23, %v1133_v25 }
 0x446   : > { %v1142_v29 = vsel %vm4296_vm7, %v1138_v27, %v1119_v14 }
 0x447   : > { %1147 = vrot.lane.b32.xlu0 %v1142_v29, %s4007_s22 }
 0x448   : > { %v1420_v30 = vpop.permute.xlu1 %1419 }
 0x449   : > { %v1422_v31 = vadd.f32 %v1420_v30, %v4259_v24  ;;  %v1423_v32 = vadd.f32 %v1420_v30, %v4266_v28 }
 0x44b   : > { %1428 = vrot.lane.b32.xlu0 %v4237_v15, %s4011_s23  ;;  %v1424_v33 = vpack.c.bf16 %v1423_v32, %v1422_v31 }
 0x44f   : > { %1426 = vrot.lane.b32.xlu0 %v1424_v33, %s4011_s23 }
 0x459   : > { %v1287_v34 = vpop.xlane.xlu0 %1286 }
 0x45a   : > { %v1291_v35 = vsub.f32 %v1283_v9, %v1287_v34 }
 0x45c   : > { %v1293_v37 = vmul.f32 1.442695, %v1291_v35 }
 0x45e   : > { %3910 = vpow2.f32 %v1293_v37 }
 0x468   : > { %v3911_v38 = vpop.eup %3910 }
 0x469   : > { %v1297_v39 = vsel %vm1117_vm5, %v3911_v38, 0.0 }
 0x46a   : > { %1298 = vadd.xlane.f32.xlu1 %v1297_v39 }
 0x47b   : > { %1153 = vrot.lane.b32.xlu1 %v1142_v29, %s4006_s6 }
 0x4a4   : > { %v1277_v40 = vpop.f32.mrb[0].mxu0 }
 0x4a5   : > { %v3642_v41 = vpop.f32.mrb[1].mxu0 }
 0x4a6   : > { %v1280_v42 = vpop.f32.mrb[2].mxu0 }
 0x4a7   : > { %v3643_v43 = vpop.f32.mrb[3].mxu0 }
 0x4b9   : > { %v1148_v45 = vpop.permute.xlu0 %1147 }
 0x4bd   : > { %v1429_v53 = vpop.permute.xlu0 %1428 }
 0x4be   : > { %v1434_v54 = vsel %vm1055_vm2, %v1429_v53, 0 }
 0x4c1   : > { %v1427_v56 = vpop.permute.xlu0 %1426 }
 0x4f7   : > { %v1299_v44 = vpop.xlane.xlu1 %1298 }
 0x4f8   : > { %3912 = vrcp.f32 %v1299_v44 }
 0x4fb   : > { %v1154_v46 = vpop.permute.xlu1 %1153 }
 0x4fc   : > { %v1159_v47 = vsel %vm1157_vm8, %v1148_v45, %v1154_v46 }
 0x4fd   : > { %v1163_v48 = vsel %vm4306_vm9, %v1159_v47, %v1142_v29 }
 0x4fe   : > { %1168 = vrot.lane.b32.xlu0 %v1163_v48, %s4009_s16 }
 0x502   : > { %v3913_v49 = vpop.eup %3912  ;;  %1174 = vrot.lane.b32.xlu0 %v1163_v48, %s4008_s30 }
 0x503   : > { %v1305_v52 = vmul.f32 %v3913_v49, %v3911_v38 }
 0x505   : > { %v1307_v55 = vpack.c.bf16 %v1305_v52, %v1305_v52 }
 0x506   : > { %1407 = vrot.lane.b32.xlu0 %v1405_v50, %s4010_s17 }
 0x507   : > { %3647 = vmatmul.mubr.msk.bf16.vlgmr.msra.gmra.mrb[12].mxu1 %vm1117_vm5, %v1307_v55 }
 0x508   : > { %3657 = vmatpush3.bf16.xpose.msra.mxu1 %v1434_v54  ;;  %3658 = vmatprep.mubr.msk.bf16.mxu1 %vm4000_vm3, %v3999_v6 }
 0x509   : > { %3668 = vmatprep.subr.bf16.mxu1 %v3999_v6 }
 0x50f   : > { %3659 = vmatmul.mubr.msk.bf16.vlgmr.msra.gmra.mrb[16].mxu1 %vm1055_vm2, %v1427_v56 }
 0x510   : > { %3670 = vmatprep.mubr.msk.bf16.mxu1 %vm4000_vm3, %v3999_v6 }
 0x570   : > { %v1169_v58 = vpop.permute.xlu0 %1168 }
 0x574   : > { %v1175_v59 = vpop.permute.xlu0 %1174 }
 0x575   : > { %v1180_v60 = vsel %vm1178_vm10, %v1169_v58, %v1175_v59 }
 0x576   : > { %v1184_v61 = vsel %vm4324_vm11, %v1180_v60, %v1163_v48 }
 0x577   : > { %v1278_v63 = vadd.f32 %v1277_v40, %v1184_v61 }
 0x578   : > { %v1408_v22 = vpop.permute.xlu0 %1407 }
 0x579   : > { %v1284_v1 = vmul.f32 0.25, %v1278_v63  ;;  %v1410_v23 = vadd.f32 %v1408_v22, %v4259_v24  ;;  %v1411_v45 = vadd.f32 %v1408_v22, %v4266_v28 }
 0x57b   : > { %v1288_v2 = vsel %vm1117_vm5, %v1284_v1, -inf  ;;  %v1412_v25 = vpack.c.bf16 %v1410_v23, %v1410_v23  ;;  %v1413_v48 = vpack.c.bf16 %v1411_v45, %v1411_v45 }
 0x57c   : > { %1289 = vmax.xlane.f32.xlu1 %v1288_v2 }
 0x58d   : > { %1550 = vrot.lane.b32.xlu1 %v4263_v26, %s4012_s28 }
 0x5da   : > { %v4384_v3 = vpop.f32.mrb[12].mxu1 }
 0x5db   : > { %v3648_v4 = vpop.f32.mrb[13].mxu1 }
 0x5dc   : > { %v1353_v5 = vpop.f32.mrb[14].mxu1 }
 0x5dd   : > { %v3649_v7 = vpop.f32.mrb[15].mxu1 }
 0x5e2   : > { %v1470_v8 = vpop.f32.mrb[16].mxu1 }
 0x5e3   : > { %1479 = vrot.lane.b32.xlu1 %v1470_v8, %s4003_s24  ;;  %v3660_v9 = vpop.f32.mrb[17].mxu1 }
 0x5e4   : > { %v1473_v10 = vpop.f32.mrb[18].mxu1 }
 0x5e5   : > { %v3661_v11 = vpop.f32.mrb[19].mxu1 }
 0x5e7   : > { %1485 = vrot.lane.b32.xlu1 %v1470_v8, %s4002_s18 }
 0x609   : > { %v1290_v12 = vpop.xlane.xlu1 %1289 }
 0x60a   : > { %v1292_v14 = vsub.f32 %v1284_v1, %v1290_v12  ;;  %v1775_v12 = vsub.s32 2, %v4248_v18 }
 0x60c   : > { %v1295_v16 = vmul.f32 1.442695, %v1292_v14  ;;  %v1788_v14 = vrot.slane %v4255_v21, %v1775_v12 }
 0x60d   : > { %v1551_v27 = vpop.permute.xlu1 %1550 }
 0x60e   : > { %3914 = vpow2.f32 %v1295_v16  ;;  %v1556_v37 = vsel %vm1055_vm2, %v1551_v27, 0 }
 0x618   : > { %v3915_v17 = vpop.eup %3914 }
 0x619   : > { %v1300_v19 = vsel %vm1117_vm5, %v3915_v17, 0.0 }
 0x61a   : > { %1301 = vadd.xlane.f32.xlu0 %v1300_v19 }
 0x630   : > { %1548 = vrot.lane.b32.xlu0 %v1412_v25, %s4011_s23 }
 0x655   : > { %v1480_v29 = vpop.permute.xlu1 %1479 }
 0x659   : > { %v1486_v30 = vpop.permute.xlu1 %1485 }
 0x65a   : > { %v1491_v31 = vsel %vm1117_vm5, %v1480_v29, %v1486_v30 }
 0x65b   : > { %1501 = vrot.lane.b32.xlu1 %v1491_v31, %s4004_s25  ;;  %1495 = vrot.lane.b32.xlu0 %v1491_v31, %s4005_s14 }
 0x6a7   : > { %v1302_v32 = vpop.xlane.xlu0 %1301 }
 0x6a8   : > { %3916 = vrcp.f32 %v1302_v32 }
 0x6ab   : > { %v1549_v38 = vpop.permute.xlu0 %1548 }
 0x6b2   : > { %v3917_v33 = vpop.eup %3916 }
 0x6b3   : > { %v1306_v34 = vmul.f32 %v3917_v33, %v3915_v17 }
 0x6b5   : > { %v1308_v35 = vpack.c.bf16 %v1306_v34, %v1306_v34 }
 0x6b7   : > { %3653 = vmatmul.mubr.msk.bf16.vlgmr.msra.gmra.mrb[4].mxu0 %vm1117_vm5, %v1308_v35 }
 0x6b8   : > { %3663 = vmatpush3.bf16.xpose.msra.mxu0 %v1556_v37  ;;  %3664 = vmatprep.mubr.msk.bf16.mxu0 %vm4000_vm3, %v3999_v6 }
 0x6b9   : > { %3674 = vmatprep.subr.bf16.mxu0 %v3999_v6 }
 0x6bf   : > { %3665 = vmatmul.mubr.msk.bf16.vlgmr.msra.gmra.mrb[8].mxu0 %vm1055_vm2, %v1549_v38 }
 0x6c0   : > { %3676 = vmatprep.mubr.msk.bf16.mxu0 %vm4000_vm3, %v3999_v6 }
 0x6cd   : > { %v1502_v39 = vpop.permute.xlu1 %1501  ;;  %v1496_v40 = vpop.permute.xlu0 %1495 }
 0x6ce   : > { %v1507_v41 = vsel %vm1136_vm6, %v1496_v40, %v1502_v39 }
 0x6cf   : > { %v1509_v42 = vsel %vm4296_vm7, %v1507_v41, %v1491_v31 }
 0x6d0   : > { %1519 = vrot.lane.b32.xlu1 %v1509_v42, %s4006_s6  ;;  %1513 = vrot.lane.b32.xlu0 %v1509_v42, %s4007_s22 }
 0x742   : > { %v1520_v43 = vpop.permute.xlu1 %1519  ;;  %v1514_v44 = vpop.permute.xlu0 %1513 }
 0x743   : > { %v1525_v46 = vsel %vm1157_vm8, %v1514_v44, %v1520_v43 }
 0x744   : > { %v1527_v47 = vsel %vm4306_vm9, %v1525_v46, %v1509_v42 }
 0x745   : > { %1537 = vrot.lane.b32.xlu1 %v1527_v47, %s4008_s30  ;;  %1531 = vrot.lane.b32.xlu0 %v1527_v47, %s4009_s16 }
 0x749   : > { %1599 = vrot.lane.b32.xlu1 %v1413_v48, %s4011_s23  ;;  %1601 = vrot.lane.b32.xlu0 %v4317_v62, %s4012_s28 }
 0x74d   : > { %1487 = vrot.lane.b32.xlu1 %v1473_v10, %s4002_s18  ;;  %1481 = vrot.lane.b32.xlu0 %v1473_v10, %s4003_s24 }
 0x78a   : > { %v4418_v49 = vpop.f32.mrb[4].mxu0 }
 0x78b   : > { %v3654_v50 = vpop.f32.mrb[5].mxu0 }
 0x78c   : > { %v1399_v52 = vpop.f32.mrb[6].mxu0 }
 0x78d   : > { %v3655_v53 = vpop.f32.mrb[7].mxu0 }
 0x792   : > { %v1592_v54 = vpop.f32.mrb[8].mxu0 }
 0x793   : > { %v3666_v55 = vpop.f32.mrb[9].mxu0 }
 0x794   : > { %v1595_v56 = vpop.f32.mrb[10].mxu0 }
 0x795   : > { %v3667_v58 = vpop.f32.mrb[11].mxu0 }
 0x7b7   : > { %v1538_v59 = vpop.permute.xlu1 %1537  ;;  %v1532_v60 = vpop.permute.xlu0 %1531 }
 0x7b8   : > { %v1543_v61 = vsel %vm1178_vm10, %v1532_v60, %v1538_v59 }
 0x7b9   : > { %v1545_v63 = vsel %vm4324_vm11, %v1543_v61, %v1527_v47  ;;  %v1776_v47 = vrot.slane %v4252_v20, %v1775_v12 }
 0x7ba   : > { %v1593_v1 = vadd.f32 %v1592_v54, %v1545_v63 }
 0x7bb   : > { %v1600_v2 = vpop.permute.xlu1 %1599  ;;  %v1602_v4 = vpop.permute.xlu0 %1601 }
 0x7bc   : > { %v1607_v5 = vsel %vm1055_vm2, %v1602_v4, 0  ;;  %v1649_v7 = vmul.f32 0.25, %v1593_v1 }
 0x7bd   : > { %3669 = vmatpush3.bf16.xpose.msra.mxu1 %v1607_v5 }
 0x7be   : > { %v1651_v8 = vsel %vm1117_vm5, %v1649_v7, -inf  ;;  %3680 = vmatprep.subr.bf16.mxu1 %v3999_v6 }
 0x7bf   : > { %v1488_v9 = vpop.permute.xlu1 %1487  ;;  %v1482_v10 = vpop.permute.xlu0 %1481  ;;  %1652 = vmax.xlane.f32.xlu0 %v1651_v8 }
 0x7c0   : > { %v1492_v11 = vsel %vm1117_vm5, %v1482_v10, %v1488_v9 }
 0x7c1   : > { %1497 = vrot.lane.b32.xlu1 %v1492_v11, %s4005_s14 }
 0x7c4   : > { %3671 = vmatmul.mubr.msk.bf16.vlgmr.msra.gmra.mrb[20].mxu1 %vm1055_vm2, %v1600_v2 }
 0x7c5   : > { %1503 = vrot.lane.b32.xlu1 %v1492_v11, %s4004_s25  ;;  %3682 = vmatprep.mubr.msk.bf16.mxu1 %vm4000_vm3, %v3999_v6 }
 0x7c9   : > { %1790 = vrot.lane.b32.xlu1 %v1788_v14, %s4013_s5 }
 0x7d5   : > { %1676 = vrot.lane.b32.xlu0 %v4282_v36, %s4011_s23 }
 0x833   : > { %v1498_v16 = vpop.permute.xlu1 %1497 }
 0x837   : > { %v1504_v17 = vpop.permute.xlu1 %1503 }
 0x838   : > { %v1508_v19 = vsel %vm1136_vm6, %v1498_v16, %v1504_v17 }
 0x839   : > { %v1510_v22 = vsel %vm4296_vm7, %v1508_v19, %v1492_v11 }
 0x83a   : > { %1521 = vrot.lane.b32.xlu0 %v1510_v22, %s4006_s6 }
 0x83b   : > { %v1791_v23 = vpop.permute.xlu1 %1790 }
 0x83c   : > { %v1793_v25 = vadd.f32 %v1791_v23, %v4259_v24  ;;  %v1794_v27 = vadd.f32 %v1791_v23, %v4266_v28 }
 0x83e   : > { %v1795_v29 = vpack.c.bf16 %v1794_v27, %v1793_v25  ;;  %1799 = vrot.lane.b32.xlu0 %v4237_v15, %s4014_s27 }
 0x842   : > { %1797 = vrot.lane.b32.xlu0 %v1795_v29, %s4014_s27 }
 0x84c   : > { %v1653_v30 = vpop.xlane.xlu0 %1652 }
 0x84d   : > { %v1657_v31 = vsub.f32 %v1649_v7, %v1653_v30 }
 0x84f   : > { %v1659_v32 = vmul.f32 1.442695, %v1657_v31 }
 0x850   : > { %v1677_v33 = vpop.permute.xlu0 %1676 }
 0x851   : > { %3918 = vpow2.f32 %v1659_v32  ;;  %v1682_v34 = vsel %vm1312_vm4, %v1677_v33, 0 }
 0x852   : > { %3675 = vmatpush3.bf16.msra.mxu0 %v1682_v34 }
 0x853   : > { %3686 = vmatprep.subr.bf16.mxu0 %v3999_v6 }
 0x85b   : > { %v3919_v35 = vpop.eup %3918 }
 0x85c   : > { %v1663_v37 = vsel %vm1117_vm5, %v3919_v35, 0.0 }
 0x85d   : > { %1664 = vadd.xlane.f32.xlu1 %v1663_v37 }
 0x86e   : > { %1515 = vrot.lane.b32.xlu1 %v1510_v22, %s4007_s22 }
 0x897   : > { %v1643_v38 = vpop.f32.mrb[20].mxu1 }
 0x898   : > { %v3672_v39 = vpop.f32.mrb[21].mxu1 }
 0x899   : > { %v1646_v40 = vpop.f32.mrb[22].mxu1 }
 0x89a   : > { %v3673_v41 = vpop.f32.mrb[23].mxu1 }
 0x8ac   : > { %v1522_v43 = vpop.permute.xlu0 %1521 }
 0x8b0   : > { %v1800_v52 = vpop.permute.xlu0 %1799 }
 0x8b1   : > { %v1805_v53 = vsel %vm1055_vm2, %v1800_v52, 0 }
 0x8b4   : > { %v1798_v55 = vpop.permute.xlu0 %1797 }
 0x8ea   : > { %v1665_v42 = vpop.xlane.xlu1 %1664 }
 0x8eb   : > { %3920 = vrcp.f32 %v1665_v42 }
 0x8ee   : > { %v1516_v44 = vpop.permute.xlu1 %1515 }
 0x8ef   : > { %v1526_v45 = vsel %vm1157_vm8, %v1516_v44, %v1522_v43 }
 0x8f0   : > { %v1528_v46 = vsel %vm4306_vm9, %v1526_v45, %v1510_v22 }
 0x8f1   : > { %1539 = vrot.lane.b32.xlu1 %v1528_v46, %s4008_s30  ;;  %1533 = vrot.lane.b32.xlu0 %v1528_v46, %s4009_s16 }
 0x8f5   : > { %v3921_v48 = vpop.eup %3920  ;;  %1778 = vrot.lane.b32.xlu1 %v1776_v47, %s4013_s5 }
 0x8f6   : > { %v1671_v50 = vmul.f32 %v3921_v48, %v3919_v35 }
 0x8f8   : > { %v1673_v54 = vpack.c.bf16 %v1671_v50, %v1671_v50 }
 0x8fa   : > { %3677 = vmatmul.mubr.msk.bf16.vlgmr.msra.gmra.mrb[12].mxu0 %vm1117_vm5, %v1673_v54 }
 0x8fb   : > { %3687 = vmatpush3.bf16.xpose.msra.mxu0 %v1805_v53  ;;  %3688 = vmatprep.mubr.msk.bf16.mxu0 %vm4000_vm3, %v3999_v6 }
 0x8fc   : > { %3698 = vmatprep.subr.bf16.mxu0 %v3999_v6 }
 0x902   : > { %3689 = vmatmul.mubr.msk.bf16.vlgmr.msra.gmra.mrb[16].mxu0 %vm1055_vm2, %v1798_v55 }
 0x903   : > { %3700 = vmatprep.mubr.msk.bf16.mxu0 %vm4000_vm3, %v3999_v6 }
 0x963   : > { %v1540_v56 = vpop.permute.xlu1 %1539  ;;  %v1534_v58 = vpop.permute.xlu0 %1533 }
 0x964   : > { %v1544_v59 = vsel %vm1178_vm10, %v1534_v58, %v1540_v56 }
 0x965   : > { %v1546_v60 = vsel %vm4324_vm11, %v1544_v59, %v1528_v46 }
 0x966   : > { %v1644_v61 = vadd.f32 %v1643_v38, %v1546_v60 }
 0x967   : > { %v4469_v2 = vpop.permute.xlu1 %1778 }
 0x968   : > { %v1650_v63 = vmul.f32 0.25, %v1644_v61  ;;  %v1781_v4 = vadd.f32 %v4469_v2, %v4259_v24  ;;  %v1782_v59 = vadd.f32 %v4469_v2, %v4266_v28 }
 0x96a   : > { %v1654_v1 = vsel %vm1117_vm5, %v1650_v63, -inf  ;;  %v1783_v5 = vpack.c.bf16 %v1781_v4, %v1781_v4 }
 0x96b   : > { %1655 = vmax.xlane.f32.xlu0 %v1654_v1 }
 0x981   : > { %1725 = vrot.lane.b32.xlu0 %v4336_v13, %s4011_s23  ;;  %s4015_s23 = smov 80  }
 0x985   : > { %1919 = vrot.lane.b32.xlu0 %v1783_v5, %s4014_s27 }
 0x9cd   : > { %v4476_v7 = vpop.f32.mrb[12].mxu0 }
 0x9ce   : > { %v3678_v8 = vpop.f32.mrb[13].mxu0 }
 0x9cf   : > { %v1721_v9 = vpop.f32.mrb[14].mxu0 }
 0x9d0   : > { %v3679_v10 = vpop.f32.mrb[15].mxu0 }
 0x9d5   : > { %v1841_v11 = vpop.f32.mrb[16].mxu0 }
 0x9d6   : > { %1850 = vrot.lane.b32.xlu0 %v1841_v11, %s4003_s24  ;;  %v3690_v12 = vpop.f32.mrb[17].mxu0 }
 0x9d7   : > { %v1844_v14 = vpop.f32.mrb[18].mxu0 }
 0x9d8   : > { %v3691_v16 = vpop.f32.mrb[19].mxu0 }
 0x9f8   : > { %v1656_v17 = vpop.xlane.xlu0 %1655 }
 0x9f9   : > { %v1658_v19 = vsub.f32 %v1650_v63, %v1656_v17  ;;  %v1784_v63 = vpack.c.bf16 %v1782_v59, %v1782_v59 }
 0x9fb   : > { %v1661_v22 = vmul.f32 1.442695, %v1658_v19 }
 0x9fc   : > { %v1726_v23 = vpop.permute.xlu0 %1725 }
 0x9fd   : > { %3922 = vpow2.f32 %v1661_v22  ;;  %v1731_v25 = vsel %vm1312_vm4, %v1726_v23, 0  ;;  %v2144_v22 = vsub.s32 3, %v4248_v18 }
 0x9fe   : > { %3681 = vmatpush3.bf16.msra.mxu1 %v1731_v25 }
 0x9ff   : > { %3692 = vmatprep.subr.bf16.mxu1 %v3999_v6  ;;  %v2157_v23 = vrot.slane %v4255_v21, %v2144_v22 }
 0xa00   : > { %v1920_v31 = vpop.permute.xlu0 %1919 }
 0xa07   : > { %v3923_v27 = vpop.eup %3922 }
 0xa08   : > { %v1666_v29 = vsel %vm1117_vm5, %v3923_v27, 0.0 }
 0xa09   : > { %1667 = vadd.xlane.f32.xlu1 %v1666_v29 }
 0xa1a   : > { %1921 = vrot.lane.b32.xlu1 %v4263_v26, %s4013_s5 }
 0xa1e   : > { %1856 = vrot.lane.b32.xlu1 %v1841_v11, %s4002_s18 }
 0xa48   : > { %v1851_v33 = vpop.permute.xlu0 %1850 }
 0xa96   : > { %v1668_v30 = vpop.xlane.xlu1 %1667 }
 0xa97   : > { %3924 = vrcp.f32 %v1668_v30 }
 0xa9a   : > { %v1922_v32 = vpop.permute.xlu1 %1921 }
 0xa9b   : > { %v1927_v40 = vsel %vm1055_vm2, %v1922_v32, 0 }
 0xa9e   : > { %v1857_v34 = vpop.permute.xlu1 %1856 }
 0xa9f   : > { %v1862_v35 = vsel %vm1117_vm5, %v1851_v33, %v1857_v34 }
 0xaa0   : > { %1872 = vrot.lane.b32.xlu1 %v1862_v35, %s4004_s25  ;;  %1866 = vrot.lane.b32.xlu0 %v1862_v35, %s4005_s14 }
 0xaa1   : > { %v3925_v37 = vpop.eup %3924 }
 0xaa2   : > { %v1672_v38 = vmul.f32 %v3925_v37, %v3923_v27 }
 0xaa4   : > { %v1674_v39 = vpack.c.bf16 %v1672_v38, %v1672_v38 }
 0xaa6   : > { %3683 = vmatmul.mubr.msk.bf16.vlgmr.msra.gmra.mrb[24].mxu1 %vm1117_vm5, %v1674_v39 }
 0xaa7   : > { %3693 = vmatpush3.bf16.xpose.msra.mxu1 %v1927_v40  ;;  %3694 = vmatprep.mubr.msk.bf16.mxu1 %vm4000_vm3, %v3999_v6 }
 0xaa8   : > { %3704 = vmatprep.subr.bf16.mxu1 %v3999_v6 }
 0xaae   : > { %3695 = vmatmul.mubr.msk.bf16.vlgmr.msra.gmra.mrb[28].mxu1 %vm1055_vm2, %v1920_v31 }
 0xaaf   : > { %3706 = vmatprep.mubr.msk.bf16.mxu1 %vm4000_vm3, %v3999_v6 }
 0xb12   : > { %v1873_v41 = vpop.permute.xlu1 %1872  ;;  %v1867_v42 = vpop.permute.xlu0 %1866 }
 0xb13   : > { %v1878_v43 = vsel %vm1136_vm6, %v1867_v42, %v1873_v41 }
 0xb14   : > { %v1880_v44 = vsel %vm4296_vm7, %v1878_v43, %v1862_v35 }
 0xb15   : > { %1890 = vrot.lane.b32.xlu1 %v1880_v44, %s4006_s6  ;;  %1884 = vrot.lane.b32.xlu0 %v1880_v44, %s4007_s22 }
 0xb79   : > { %v4501_v45 = vpop.f32.mrb[24].mxu1 }
 0xb7a   : > { %v3866_v46 = vpack.i.bf16 %v4501_v45, %v4476_v7  ;;  %v3684_v47 = vpop.f32.mrb[25].mxu1 }
 0xb7b   : > { %v1770_v48 = vpop.f32.mrb[26].mxu1 }
 0xb7c   : > { %v3685_v50 = vpop.f32.mrb[27].mxu1 }
 0xb81   : > { %v1963_v52 = vpop.f32.mrb[28].mxu1 }
 0xb82   : > { %v3696_v53 = vpop.f32.mrb[29].mxu1 }
 0xb83   : > { %v1966_v54 = vpop.f32.mrb[30].mxu1  ;;  %v2145_v53 = vrot.slane %v4252_v20, %v2144_v22 }
 0xb84   : > { %v3697_v55 = vpop.f32.mrb[31].mxu1 }
 0xb87   : > { %v1891_v56 = vpop.permute.xlu1 %1890  ;;  %v1885_v58 = vpop.permute.xlu0 %1884 }
 0xb88   : > { %v1896_v60 = vsel %vm1157_vm8, %v1885_v58, %v1891_v56 }
 0xb89   : > { %v1898_v61 = vsel %vm4306_vm9, %v1896_v60, %v1880_v44 }
 0xb8a   : > { %1908 = vrot.lane.b32.xlu1 %v1898_v61, %s4008_s30  ;;  %1902 = vrot.lane.b32.xlu0 %v1898_v61, %s4009_s16 }
 0xb8e   : > { %1970 = vrot.lane.b32.xlu1 %v1784_v63, %s4014_s27  ;;  %1972 = vrot.lane.b32.xlu0 %v4317_v62, %s4013_s5 }
 0xb92   : > { %1858 = vrot.lane.b32.xlu1 %v1844_v14, %s4002_s18  ;;  %1852 = vrot.lane.b32.xlu0 %v1844_v14, %s4003_s24 }
 0xbfc   : > { %v1909_v1 = vpop.permute.xlu1 %1908  ;;  %v1903_v2 = vpop.permute.xlu0 %1902 }
 0xbfd   : > { %v1914_v4 = vsel %vm1178_vm10, %v1903_v2, %v1909_v1 }
 0xbfe   : > { %v1916_v5 = vsel %vm4324_vm11, %v1914_v4, %v1898_v61 }
 0xbff   : > { %v1964_v8 = vadd.f32 %v1963_v52, %v1916_v5 }
 0xc00   : > { %v1971_v9 = vpop.permute.xlu1 %1970  ;;  %v1973_v10 = vpop.permute.xlu0 %1972 }
 0xc01   : > { %v1978_v11 = vsel %vm1055_vm2, %v1973_v10, 0  ;;  %v2020_v12 = vmul.f32 0.25, %v1964_v8 }
 0xc02   : > { %3699 = vmatpush3.bf16.xpose.msra.mxu0 %v1978_v11 }
 0xc03   : > { %v2022_v16 = vsel %vm1117_vm5, %v2020_v12, -inf  ;;  %3710 = vmatprep.subr.bf16.mxu0 %v3999_v6 }
 0xc04   : > { %v1859_v17 = vpop.permute.xlu1 %1858  ;;  %2023 = vmax.xlane.f32.xlu0 %v2022_v16  ;;  %v1853_v14 = vpop.permute.xlu0 %1852 }
 0xc05   : > { %v1863_v19 = vsel %vm1117_vm5, %v1853_v14, %v1859_v17 }
 0xc06   : > { %1868 = vrot.lane.b32.xlu1 %v1863_v19, %s4005_s14 }
 0xc09   : > { %3701 = vmatmul.mubr.msk.bf16.vlgmr.msra.gmra.mrb[20].mxu0 %vm1055_vm2, %v1971_v9 }
 0xc0a   : > { %1874 = vrot.lane.b32.xlu1 %v1863_v19, %s4004_s25  ;;  %3712 = vmatprep.mubr.msk.bf16.mxu0 %vm4000_vm3, %v3999_v6 }
 0xc0e   : > { %2159 = vrot.lane.b32.xlu1 %v2157_v23, %s4012_s28 }
 0xc1a   : > { %2046 = vrot.lane.b32.xlu0 %v4282_v36, %s4014_s27 }
 0xc78   : > { %v1869_v25 = vpop.permute.xlu1 %1868 }
 0xc7c   : > { %v1875_v27 = vpop.permute.xlu1 %1874 }
 0xc7d   : > { %v1879_v29 = vsel %vm1136_vm6, %v1869_v25, %v1875_v27 }
 0xc7e   : > { %v1881_v18 = vsel %vm4296_vm7, %v1879_v29, %v1863_v19 }
 0xc7f   : > { %1892 = vrot.lane.b32.xlu0 %v1881_v18, %s4006_s6 }
 0xc80   : > { %v2160_v30 = vpop.permute.xlu1 %2159 }
 0xc81   : > { %v2162_v21 = vadd.f32 %v2160_v30, %v4259_v24  ;;  %v2163_v31 = vadd.f32 %v2160_v30, %v4266_v28 }
 0xc83   : > { %v2164_v32 = vpack.c.bf16 %v2163_v31, %v2162_v21  ;;  %2168 = vrot.lane.b32.xlu0 %v4237_v15, %s4015_s23 }
 0xc87   : > { %2166 = vrot.lane.b32.xlu0 %v2164_v32, %s4015_s23 }
 0xc91   : > { %v2024_v33 = vpop.xlane.xlu0 %2023 }
 0xc92   : > { %v2028_v34 = vsub.f32 %v2020_v12, %v2024_v33 }
 0xc94   : > { %v2030_v35 = vmul.f32 1.442695, %v2028_v34 }
 0xc95   : > { %v2047_v37 = vpop.permute.xlu0 %2046 }
 0xc96   : > { %3926 = vpow2.f32 %v2030_v35  ;;  %v2052_v38 = vsel %vm1312_vm4, %v2047_v37, 0 }
 0xc97   : > { %3705 = vmatpush3.bf16.msra.mxu1 %v2052_v38 }
 0xc98   : > { %3716 = vmatprep.subr.bf16.mxu1 %v3999_v6 }
 0xca0   : > { %v3927_v39 = vpop.eup %3926 }
 0xca1   : > { %v2034_v40 = vsel %vm1117_vm5, %v3927_v39, 0.0 }
 0xca2   : > { %2035 = vadd.xlane.f32.xlu1 %v2034_v40 }
 0xcb3   : > { %1886 = vrot.lane.b32.xlu1 %v1881_v18, %s4007_s22 }
 0xcdc   : > { %v2014_v41 = vpop.f32.mrb[20].mxu0 }
 0xcdd   : > { %v3702_v15 = vpop.f32.mrb[21].mxu0 }
 0xcde   : > { %v2017_v42 = vpop.f32.mrb[22].mxu0 }
 0xcdf   : > { %v3703_v43 = vpop.f32.mrb[23].mxu0 }
 0xcf1   : > { %v1893_v47 = vpop.permute.xlu0 %1892 }
 0xcf5   : > { %v2169_v56 = vpop.permute.xlu0 %2168 }
 0xcf6   : > { %v2174_v58 = vsel %vm1055_vm2, %v2169_v56, 0 }
 0xcf9   : > { %v2167_v60 = vpop.permute.xlu0 %2166 }
 0xd2f   : > { %v2036_v44 = vpop.xlane.xlu1 %2035 }
 0xd30   : > { %3928 = vrcp.f32 %v2036_v44 }
 0xd33   : > { %v1887_v48 = vpop.permute.xlu1 %1886 }
 0xd34   : > { %v1897_v50 = vsel %vm1157_vm8, %v1887_v48, %v1893_v47 }
 0xd35   : > { %v1899_v52 = vsel %vm4306_vm9, %v1897_v50, %v1881_v18 }
 0xd36   : > { %1910 = vrot.lane.b32.xlu1 %v1899_v52, %s4008_s30  ;;  %1904 = vrot.lane.b32.xlu0 %v1899_v52, %s4009_s16 }
 0xd3a   : > { %v3929_v54 = vpop.eup %3928  ;;  %2147 = vrot.lane.b32.xlu1 %v2145_v53, %s4012_s28 }
 0xd3b   : > { %v2042_v55 = vmul.f32 %v3929_v54, %v3927_v39 }
 0xd3d   : > { %v2044_v59 = vpack.c.bf16 %v2042_v55, %v2042_v55 }
 0xd3f   : > { %3707 = vmatmul.mubr.msk.bf16.vlgmr.msra.gmra.mrb[32].mxu1 %vm1117_vm5, %v2044_v59 }
 0xd40   : > { %3717 = vmatpush3.bf16.xpose.msra.mxu1 %v2174_v58  ;;  %3718 = vmatprep.mubr.msk.bf16.mxu1 %vm4000_vm3, %v3999_v6 }
 0xd41   : > { %3728 = vmatprep.subr.bf16.mxu1 %v3999_v6 }
 0xd47   : > { %3719 = vmatmul.mubr.msk.bf16.vlgmr.msra.gmra.mrb[36].mxu1 %vm1055_vm2, %v2167_v60 }
 0xd48   : > { %3730 = vmatprep.mubr.msk.bf16.mxu1 %vm4000_vm3, %v3999_v6 }
 0xda8   : > { %v1911_v20 = vpop.permute.xlu1 %1910  ;;  %v1905_v61 = vpop.permute.xlu0 %1904 }
 0xda9   : > { %v1915_v63 = vsel %vm1178_vm10, %v1905_v61, %v1911_v20 }
 0xdaa   : > { %v1917_v1 = vsel %vm4324_vm11, %v1915_v63, %v1899_v52 }
 0xdab   : > { %v2015_v2 = vadd.f32 %v2014_v41, %v1917_v1 }
 0xdac   : > { %v2148_v8 = vpop.permute.xlu1 %2147 }
 0xdad   : > { %v2021_v4 = vmul.f32 0.25, %v2015_v2  ;;  %v2150_v9 = vadd.f32 %v2148_v8, %v4259_v24  ;;  %v2151_v32 = vadd.f32 %v2148_v8, %v4266_v28 }
 0xdaf   : > { %v2025_v5 = vsel %vm1117_vm5, %v2021_v4, -inf  ;;  %v2152_v10 = vpack.c.bf16 %v2150_v9, %v2150_v9  ;;  %v2153_v33 = vpack.c.bf16 %v2151_v32, %v2151_v32 }
 0xdb0   : > { %2026 = vmax.xlane.f32.xlu0 %v2025_v5 }
 0xdc6   : > { %2094 = vrot.lane.b32.xlu0 %v4336_v13, %s4014_s27 }
 0xdca   : > { %2341 = vrot.lane.b32.xlu0 %v4317_v62, %s4010_s17 }
 0xdce   : > { %2288 = vrot.lane.b32.xlu0 %v2152_v10, %s4015_s23 }
 0xe12   : > { %v4572_v11 = vpop.f32.mrb[32].mxu1 }
 0xe13   : > { %v3708_v12 = vpop.f32.mrb[33].mxu1 }
 0xe14   : > { %v2091_v16 = vpop.f32.mrb[34].mxu1 }
 0xe15   : > { %v3709_v17 = vpop.f32.mrb[35].mxu1 }
 0xe1a   : > { %v2210_v14 = vpop.f32.mrb[36].mxu1 }
 0xe1b   : > { %v3720_v19 = vpop.f32.mrb[37].mxu1  ;;  %2219 = vrot.lane.b32.xlu0 %v2210_v14, %s4003_s24 }
 0xe1c   : > { %v2213_v22 = vpop.f32.mrb[38].mxu1 }
 0xe1d   : > { %v3721_v23 = vpop.f32.mrb[39].mxu1 }
 0xe1f   : > { %2225 = vrot.lane.b32.xlu0 %v2210_v14, %s4002_s18 }
 0xe3d   : > { %v2027_v24 = vpop.xlane.xlu0 %2026 }
 0xe3e   : > { %v2029_v25 = vsub.f32 %v2021_v4, %v2027_v24 }
 0xe40   : > { %v2032_v27 = vmul.f32 1.442695, %v2029_v25 }
 0xe41   : > { %v2095_v62 = vpop.permute.xlu0 %2094 }
 0xe42   : > { %3930 = vpow2.f32 %v2032_v27  ;;  %v2100_v29 = vsel %vm1312_vm4, %v2095_v62, 0 }
 0xe43   : > { %3711 = vmatpush3.bf16.msra.mxu0 %v2100_v29 }
 0xe44   : > { %3722 = vmatprep.subr.bf16.mxu0 %v3999_v6 }
 0xe45   : > { %v2342_v18 = vpop.permute.xlu0 %2341 }
 0xe46   : > { %v2347_v30 = vsel %vm1055_vm2, %v2342_v18, 0 }
 0xe47   : > { %3729 = vmatpush3.bf16.xpose.msra.mxu1 %v2347_v30 }
 0xe48   : > { %3740 = vmatprep.subr.bf16.mxu1 %v3999_v6 }
 0xe49   : > { %v2289_v34 = vpop.permute.xlu0 %2288 }
 0xe4c   : > { %v3931_v21 = vpop.eup %3930 }
 0xe4d   : > { %v2037_v31 = vsel %vm1117_vm5, %v3931_v21, 0.0 }
 0xe4e   : > { %2038 = vadd.xlane.f32.xlu1 %v2037_v31 }
 0xe5f   : > { %2290 = vrot.lane.b32.xlu1 %v4263_v26, %s4010_s17 }
 0xe63   : > { %2339 = vrot.lane.b32.xlu1 %v2153_v33, %s4015_s23 }
 0xe67   : > { %2221 = vrot.lane.b32.xlu1 %v2213_v22, %s4003_s24 }
 0xe6b   : > { %2227 = vrot.lane.b32.xlu1 %v2213_v22, %s4002_s18  ;;  %s4903_s18 = sld [smem:[#allocation7_spill]] }
 0xe8d   : > { %v2220_v35 = vpop.permute.xlu0 %2219 }
 0xe91   : > { %v2226_v37 = vpop.permute.xlu0 %2225 }
 0xe92   : > { %v2231_v38 = vsel %vm1117_vm5, %v2220_v35, %v2226_v37 }
 0xe93   : > { %2235 = vrot.lane.b32.xlu0 %v2231_v38, %s4005_s14 }
 0xe97   : > { %2241 = vrot.lane.b32.xlu0 %v2231_v38, %s4004_s25 }
 0xedb   : > { %v2039_v28 = vpop.xlane.xlu1 %2038 }
 0xedc   : > { %3932 = vrcp.f32 %v2039_v28 }
 0xedf   : > { %v2291_v39 = vpop.permute.xlu1 %2290 }
 0xee0   : > { %v2296_v43 = vsel %vm1055_vm2, %v2291_v39, 0 }
 0xee3   : > { %v2340_v26 = vpop.permute.xlu1 %2339 }
 0xee4   : > { %3731 = vmatmul.mubr.msk.bf16.vlgmr.msra.gmra.mrb[40].mxu1 %vm1055_vm2, %v2340_v26 }
 0xee5   : > { %3742 = vmatprep.mubr.msk.bf16.mxu1 %vm4000_vm3, %v3999_v6 }
 0xee6   : > { %v3933_v40 = vpop.eup %3932 }
 0xee7   : > { %v2043_v41 = vmul.f32 %v3933_v40, %v3931_v21  ;;  %v2222_v15 = vpop.permute.xlu1 %2221 }
 0xee9   : > { %v2045_v42 = vpack.c.bf16 %v2043_v41, %v2043_v41 }
 0xeeb   : > { %v2228_v44 = vpop.permute.xlu1 %2227  ;;  %3713 = vmatmul.mubr.msk.bf16.vlgmr.msra.gmra.mrb[24].mxu0 %vm1117_vm5, %v2045_v42 }
 0xeec   : > { %3723 = vmatpush3.bf16.xpose.msra.mxu0 %v2296_v43  ;;  %v2232_v47 = vsel %vm1117_vm5, %v2222_v15, %v2228_v44  ;;  %3724 = vmatprep.mubr.msk.bf16.mxu0 %vm4000_vm3, %v3999_v6 }
 0xeed   : > { %2237 = vrot.lane.b32.xlu1 %v2232_v47, %s4005_s14  ;;  %3734 = vmatprep.subr.bf16.mxu0 %v3999_v6  ;;  %s4907_s14 = sld [smem:[#allocation16_spill]] (!%p3526_p6) }
 0xef1   : > { %2243 = vrot.lane.b32.xlu1 %v2232_v47, %s4004_s25 }
 0xef3   : > { %3725 = vmatmul.mubr.msk.bf16.vlgmr.msra.gmra.mrb[28].mxu0 %vm1055_vm2, %v2289_v34 }
 0xef4   : > { %3736 = vmatprep.mubr.msk.bf16.mxu0 %vm4000_vm3, %v3999_v6 }
 0xf05   : > { %v2236_v48 = vpop.permute.xlu0 %2235 }
 0xf09   : > { %v2242_v50 = vpop.permute.xlu0 %2241 }
 0xf0a   : > { %v2247_v52 = vsel %vm1136_vm6, %v2236_v48, %v2242_v50 }
 0xf0b   : > { %v2249_v53 = vsel %vm4296_vm7, %v2247_v52, %v2231_v38 }
 0xf0c   : > { %2253 = vrot.lane.b32.xlu0 %v2249_v53, %s4007_s22 }
 0xf10   : > { %2259 = vrot.lane.b32.xlu0 %v2249_v53, %s4006_s6 }
 0xf5f   : > { %v2238_v54 = vpop.permute.xlu1 %2237 }
 0xf63   : > { %v2244_v55 = vpop.permute.xlu1 %2243 }
 0xf64   : > { %v2248_v56 = vsel %vm1136_vm6, %v2238_v54, %v2244_v55  ;;  %v3894_v54 = vld [vmem:[%s4903_s18] sm:$0xff]   ;;  %v3895_v55 = vld [vmem:[%s4903_s18 + $0x8] sm:$0xff]  }
 0xf65   : > { %v2250_v58 = vsel %vm4296_vm7, %v2248_v56, %v2232_v47  ;;  %v3896_v56 = vld [vmem:[%s4903_s18 + $0x10] sm:$0xff]  }
 0xf66   : > { %2255 = vrot.lane.b32.xlu1 %v2250_v58, %s4007_s22  ;;  %s4909_s22 = sld [smem:[#allocation17_spill]] (!%p3526_p6) }
 0xf6a   : > { %2261 = vrot.lane.b32.xlu1 %v2250_v58, %s4006_s6 }
 0xf7e   : > { %v2254_v59 = vpop.permute.xlu0 %2253 }
 0xf82   : > { %v2260_v60 = vpop.permute.xlu0 %2259 }
 0xf83   : > { %v2265_v20 = vsel %vm1157_vm8, %v2254_v59, %v2260_v60 }
 0xf84   : > { %v2267_v61 = vsel %vm4306_vm9, %v2265_v20, %v2249_v53 }
 0xf85   : > { %2271 = vrot.lane.b32.xlu0 %v2267_v61, %s4009_s16 }
 0xf89   : > { %2277 = vrot.lane.b32.xlu0 %v2267_v61, %s4008_s30 }
 0xfb7   : > { %v2383_v63 = vpop.f32.mrb[40].mxu1 }
 0xfb8   : > { %v3732_v1 = vpop.f32.mrb[41].mxu1 }
 0xfb9   : > { %v2386_v2 = vpop.f32.mrb[42].mxu1 }
 0xfba   : > { %v3733_v51 = vpop.f32.mrb[43].mxu1 }
 0xfbe   : > { %v2136_v4 = vpop.f32.mrb[24].mxu0 }
 0xfbf   : > { %v3871_v5 = vpack.i.bf16 %v2136_v4, %v4572_v11  ;;  %v3714_v8 = vpop.f32.mrb[25].mxu0 }
 0xfc0   : > { %v2139_v9 = vpop.f32.mrb[26].mxu0 }
 0xfc1   : > { %v3715_v10 = vpop.f32.mrb[27].mxu0 }
 0xfc6   : > { %v2332_v12 = vpop.f32.mrb[28].mxu0 }
 0xfc7   : > { %v3726_v16 = vpop.f32.mrb[29].mxu0 }
 0xfc8   : > { %v2335_v17 = vpop.f32.mrb[30].mxu0 }
 0xfc9   : > { %v3727_v14 = vpop.f32.mrb[31].mxu0 }
 0xfd8   : > { %v2256_v19 = vpop.permute.xlu1 %2255 }
 0xfdc   : > { %v2262_v22 = vpop.permute.xlu1 %2261 }
 0xfdd   : > { %v2266_v23 = vsel %vm1157_vm8, %v2256_v19, %v2262_v22 }
 0xfde   : > { %v2268_v24 = vsel %vm4306_vm9, %v2266_v23, %v2250_v58 }
 0xfdf   : > { %2273 = vrot.lane.b32.xlu1 %v2268_v24, %s4009_s16  ;;  %s4914_s16 = sld [smem:[#allocation22_spill]] (!%p3526_p6) }
 0xfe3   : > { %2279 = vrot.lane.b32.xlu1 %v2268_v24, %s4008_s30 }
 0xff7   : > { %v2272_v25 = vpop.permute.xlu0 %2271 }
 0xffb   : > { %v2278_v11 = vpop.permute.xlu0 %2277 }
 0xffc   : > { %v2283_v27 = vsel %vm1178_vm10, %v2272_v25, %v2278_v11 }
 0xffd   : > { %v2285_v62 = vsel %vm4324_vm11, %v2283_v27, %v2267_v61  ;;  %v3897_v61 = vld [vmem:[%s4903_s18 + $0x18] sm:$0xff]  }
 0xffe   : > { %v2333_v29 = vadd.f32 %v2332_v12, %v2285_v62 }
0x1000   : > { %v2389_v18 = vmul.f32 0.25, %v2333_v29 }
0x1002   : > { %v2391_v30 = vsel %vm1117_vm5, %v2389_v18, -inf }
0x1003   : > { %2392 = vmax.xlane.f32.xlu0 %v2391_v30 }
0x1051   : > { %v2274_v21 = vpop.permute.xlu1 %2273 }
0x1055   : > { %v2280_v31 = vpop.permute.xlu1 %2279 }
0x1056   : > { %v2284_v57 = vsel %vm1178_vm10, %v2274_v21, %v2280_v31 }
0x1057   : > { %v2286_v32 = vsel %vm4324_vm11, %v2284_v57, %v2268_v24 }
0x1058   : > { %v2384_v33 = vadd.f32 %v2383_v63, %v2286_v32 }
0x105a   : > { %v2390_v34 = vmul.f32 0.25, %v2384_v33 }
0x105c   : > { %v2394_v35 = vsel %vm1117_vm5, %v2390_v34, -inf }
0x105d   : > { %2395 = vmax.xlane.f32.xlu1 %v2394_v35 }
0x106e   : > { %2415 = vrot.lane.b32.xlu1 %v4282_v36, %s4015_s23 }
0x1072   : > { %3867 = vrot.lane.b32.xlu1 %v3866_v46, %s4010_s17 }
0x1076   : > { %3872 = vrot.lane.b32.xlu1 %v3871_v5, %s4013_s5 }
0x1090   : > { %v2393_v37 = vpop.xlane.xlu0 %2392 }
0x1091   : > { %v2397_v38 = vsub.f32 %v2389_v18, %v2393_v37  ;;  %v3958_v18 = vld [vmem:[#allocation2] sm:$0xff] }
0x1093   : > { %v2399_v28 = vmul.f32 1.442695, %v2397_v38 }
0x1095   : > { %3934 = vpow2.f32 %v2399_v28 }
0x109f   : > { %v3935_v0 = vpop.eup %3934 }
0x10a0   : > { %v2403_v39 = vsel %vm1117_vm5, %v3935_v0, 0.0 }
0x10a1   : > { %2404 = vadd.xlane.f32.xlu0 %v2403_v39 }
0x10ea   : > { %v2396_v26 = vpop.xlane.xlu1 %2395 }
0x10eb   : > { %v2398_v40 = vsub.f32 %v2390_v34, %v2396_v26 }
0x10ed   : > { %v2401_v41 = vmul.f32 1.442695, %v2398_v40 }
0x10ee   : > { %v2416_v15 = vpop.permute.xlu1 %2415 }
0x10ef   : > { %3936 = vpow2.f32 %v2401_v41  ;;  %v2421_v36 = vsel %vm1312_vm4, %v2416_v15, 0  ;;  %v3898_v15 = vld [vmem:[%s4197_s19] sm:$0xff]  }
0x10f0   : > { %3735 = vmatpush3.bf16.msra.mxu0 %v2421_v36  ;;  %v3899_v36 = vld [vmem:[%s4197_s19 + $0x8] sm:$0xff]  }
0x10f1   : > { %3746 = vmatprep.subr.bf16.mxu0 %v3999_v6 }
0x10f2   : > { %v3868_v5 = vpop.permute.xlu1 %3867 }
0x10f3   : > { %v3870_v9 = vunpack.i.h.bf16 %v3868_v5  ;;  %v3869_v10 = vunpack.i.l.bf16 %v3868_v5  ;;  %v3908_v5 = vld [vmem:[%s4206_s0 + $0x30] sm:$0xff]  }
0x10f5   : > { %v2536_v14 = vsel %vm1055_vm2, %v4418_v49, %v3870_v9  ;;  %v2535_v19 = vsel %vm1055_vm2, %v4384_v3, %v3869_v10  ;;  %v3959_v3 = vld [vmem:[#allocation2 + $0x8] sm:$0xff]  ;;  %v3509_v9 = vld [vmem:[%s897_s20] ss:$0 sm:$0xff]  ;;  %s4913_s20 = sld [smem:[#allocation23_spill]] (!%p3526_p6) }
0x10f6   : > { %v3873_v8 = vpop.permute.xlu1 %3872 }
0x10f7   : > { %v3875_v12 = vunpack.i.h.bf16 %v3873_v8  ;;  %v3874_v16 = vunpack.i.l.bf16 %v3873_v8  ;;  %v3909_v8 = vld [vmem:[%s4206_s0 + $0x38] sm:$0xff]  }
0x10f9   : > { %v3937_v7 = vpop.eup %3936  ;;  %v2539_v24 = vsel %vm2537_vm12, %v2536_v14, %v3875_v12  ;;  %v2538_v25 = vsel %vm2537_vm12, %v2535_v19, %v3874_v16 }
0x10fa   : > { %v2406_v45 = vsel %vm1117_vm5, %v3937_v7, 0.0 }
0x10fb   : > { %2407 = vadd.xlane.f32.xlu0 %v2406_v45  ;;  %v3901_v45 = vld [vmem:[%s4197_s19 + $0x18] sm:$0xff]  }
0x1111   : > { %2463 = vrot.lane.b32.xlu0 %v4336_v13, %s4015_s23 }
0x112e   : > { %v2405_v46 = vpop.xlane.xlu0 %2404 }
0x112f   : > { %3938 = vrcp.f32 %v2405_v46 }
0x1139   : > { %v3939_v42 = vpop.eup %3938 }
0x113a   : > { %v2411_v43 = vmul.f32 %v3939_v42, %v3935_v0 }
0x113c   : > { %v2413_v44 = vpack.c.bf16 %v2411_v43, %v2411_v43 }
0x113e   : > { %3737 = vmatmul.mubr.msk.bf16.vlgmr.msra.gmra.mrb[32].mxu0 %vm1117_vm5, %v2413_v44 }
0x113f   : > { %3754 = vmatprep.mubr.msk.bf16.mxu0 %vm4000_vm3, %v3999_v6  ;;  %3747 = vmatpush3.bf16.msra.mxu0 %v3894_v54 }
0x1140   : > { %3748 = vmatprep.subr.bf16.mxu0 %v3999_v6 }
0x1143   : > { %3749 = vmatpush3.bf16.msra.mxu0 %v3895_v55 }
0x1144   : > { %3750 = vmatprep.subr.bf16.mxu0 %v3999_v6 }
0x1147   : > { %3751 = vmatpush3.bf16.msra.mxu0 %v3896_v56  ;;  %v3508_v56 = vld [vmem:[%s889_s21] ss:$0 sm:$0xff] }
0x1148   : > { %3752 = vmatprep.subr.bf16.mxu0 %v3999_v6 }
0x114b   : > { %3753 = vmatpush3.bf16.msra.mxu0 %v3897_v61  ;;  %v3902_v61 = vld [vmem:[%s4206_s0] sm:$0xff]  }
0x114c   : > { %3770 = vmatprep.subr.bf16.mxu0 %v3999_v6 }
0x1188   : > { %v2408_v47 = vpop.xlane.xlu0 %2407 }
0x1189   : > { %3940 = vrcp.f32 %v2408_v47 }
0x118c   : > { %v2464_v48 = vpop.permute.xlu0 %2463 }
0x118d   : > { %v2469_v50 = vsel %vm1312_vm4, %v2464_v48, 0 }
0x118e   : > { %3741 = vmatpush3.bf16.msra.mxu1 %v2469_v50 }
0x118f   : > { %3758 = vmatprep.subr.bf16.mxu1 %v3999_v6 }
0x1193   : > { %v3941_v13 = vpop.eup %3940 }
0x1194   : > { %v2412_v52 = vmul.f32 %v3941_v13, %v3937_v7  ;;  %v3900_v7 = vld [vmem:[%s4197_s19 + $0x10] sm:$0xff]   ;;  %v3507_v13 = vld [vmem:[%s886_s15] ss:$0 sm:$0xff]  ;;  %s4908_s15 = sld [smem:[#allocation19_spill]] (!%p3526_p6)  ;;  %s4912_s19 = sld [smem:[#allocation20_spill]] (!%p3526_p6) }
0x1196   : > { %v2414_v53 = vpack.c.bf16 %v2412_v52, %v2412_v52 }
0x1198   : > { %3743 = vmatmul.mubr.msk.bf16.vlgmr.msra.gmra.mrb[44].mxu1 %vm1117_vm5, %v2414_v53 }
0x1199   : > { %3766 = vmatprep.mubr.msk.bf16.mxu1 %vm4000_vm3, %v3999_v6  ;;  %3759 = vmatpush3.bf16.msra.mxu1 %v3898_v15 }
0x119a   : > { %3760 = vmatprep.subr.bf16.mxu1 %v3999_v6 }
0x119d   : > { %3761 = vmatpush3.bf16.msra.mxu1 %v3899_v36 }
0x119e   : > { %3762 = vmatprep.subr.bf16.mxu1 %v3999_v6 }
0x11a1   : > { %3763 = vmatpush3.bf16.msra.mxu1 %v3900_v7 }
0x11a2   : > { %3764 = vmatprep.subr.bf16.mxu1 %v3999_v6 }
0x11a5   : > { %3765 = vmatpush3.bf16.msra.mxu1 %v3901_v45 }
0x1211   : > { %v2457_v58 = vpop.f32.mrb[32].mxu0 }
0x1212   : > { %v3738_v59 = vpop.f32.mrb[33].mxu0 }
0x1213   : > { %v2460_v60 = vpop.f32.mrb[34].mxu0 }
0x1214   : > { %v3739_v20 = vpop.f32.mrb[35].mxu0 }
0x126b   : > { %v2505_v63 = vpop.f32.mrb[44].mxu1 }
0x126c   : > { %v3876_v1 = vpack.i.bf16 %v2505_v63, %v2457_v58  ;;  %v3744_v2 = vpop.f32.mrb[45].mxu1  ;;  %v3903_v63 = vld [vmem:[%s4206_s0 + $0x8] sm:$0xff]  }
0x126d   : > { %v2508_v51 = vpop.f32.mrb[46].mxu1  ;;  %v3905_v2 = vld [vmem:[%s4206_s0 + $0x18] sm:$0xff]  }
0x126e   : > { %v3745_v4 = vpop.f32.mrb[47].mxu1  ;;  %3877 = vrot.lane.b32.xlu0 %v3876_v1, %s4012_s28  ;;  %v3904_v1 = vld [vmem:[%s4206_s0 + $0x10] sm:$0xff]   ;;  %v3906_v51 = vld [vmem:[%s4206_s0 + $0x20] sm:$0xff]   ;;  %s4905_s28 = sld [smem:[#allocation15_spill]] (!%p3526_p6) }
0x126f   : > { %v3907_v4 = vld [vmem:[%s4206_s0 + $0x28] sm:$0xff]  }
0x1274   : > { %s4906_s5 = smov (!%p3526_p6), %s4905_s28 }
0x12e0   : > { %v3878_v17 = vpop.permute.xlu0 %3877 }
0x12e1   : > { %v3880_v22 = vunpack.i.h.bf16 %v3878_v17  ;;  %v3879_v23 = vunpack.i.l.bf16 %v3878_v17 }
0x12e3   : > { %v2542_v11 = vsel %vm2540_vm13, %v2539_v24, %v3880_v22  ;;  %v2541_v27 = vsel %vm2540_vm13, %v2538_v25, %v3879_v23 }
0x12e4   : > { %v2543_v62 = vpack.c.bf16 %v2542_v11, %v2541_v27 }
0x12e6   : > { %3755 = vmatmul.mubr.msk.bf16.vlgmr.msra.gmra.mrb[36].mxu0 %vm980_vm1, %v2543_v62 }
0x12e7   : > { %3786 = vmatprep.mubr.msk.bf16.mxu0 %vm4000_vm3, %v3999_v6  ;;  %3771 = vmatpush3.bf16.msra.mxu0 %v3902_v61 }
0x12e8   : > { %3772 = vmatprep.subr.bf16.mxu0 %v3999_v6 }
0x12eb   : > { %3773 = vmatpush3.bf16.msra.mxu0 %v3903_v63 }
0x12ec   : > { %3774 = vmatprep.subr.bf16.mxu0 %v3999_v6 }
0x12ef   : > { %3775 = vmatpush3.bf16.msra.mxu0 %v3904_v1 }
0x12f0   : > { %3776 = vmatprep.subr.bf16.mxu0 %v3999_v6 }
0x12f3   : > { %3777 = vmatpush3.bf16.msra.mxu0 %v3905_v2 }
0x12f4   : > { %3778 = vmatprep.subr.bf16.mxu0 %v3999_v6 }
0x12f7   : > { %3779 = vmatpush3.bf16.msra.mxu0 %v3906_v51  ;;  %v3515_v51 = vld [vmem:[%s905_s26] ss:$0 sm:$0xff] }
0x12f8   : > { %3780 = vmatprep.subr.bf16.mxu0 %v3999_v6 }
0x12fb   : > { %3781 = vmatpush3.bf16.msra.mxu0 %v3907_v4 }
0x12fc   : > { %3782 = vmatprep.subr.bf16.mxu0 %v3999_v6 }
0x12ff   : > { %3783 = vmatpush3.bf16.msra.mxu0 %v3908_v5 }
0x1300   : > { %3784 = vmatprep.subr.bf16.mxu0 %v3999_v6 }
0x1303   : > { %3785 = vmatpush3.bf16.msra.mxu0 %v3909_v8 }
0x13b9   : > { %v2613_v29 = vpop.f32.mrb[36].mxu0 }
0x13ba   : > { %v2614_v49 = vadd.f32 %v3958_v18, %v2613_v29  ;;  %v3756_v30 = vpop.f32.mrb[37].mxu0 }
0x13bb   : > { %v2616_v21 = vpop.f32.mrb[38].mxu0 }
0x13bc   : > { %v2617_v31 = vadd.f32 %v3959_v3, %v2616_v21  ;;  %v3757_v57 = vpop.f32.mrb[39].mxu0  ;;  %v2622_v32 = vsel %vm980_vm1, %v2614_v49, 0.0 }
0x13bd   : > { %2623 = vadd.xlane.f32.xlu1 %v2622_v32 }
0x13be   : > { %v2625_v33 = vsel %vm980_vm1, %v2617_v31, 0.0 }
0x13bf   : > { %2626 = vadd.xlane.f32.xlu0 %v2625_v33 }
0x144a   : > { %v2624_v34 = vpop.xlane.xlu1 %2623 }
0x144b   : > { %v2629_v35 = vmul.f32 0.015625, %v2624_v34 }
0x144c   : > { %v2627_v37 = vpop.xlane.xlu0 %2626 }
0x144d   : > { %v2631_v38 = vsub.f32 %v2614_v49, %v2629_v35  ;;  %v2630_v28 = vmul.f32 0.015625, %v2627_v37 }
0x144f   : > { %v2632_v0 = vsub.f32 %v2617_v31, %v2630_v28  ;;  %v2633_v39 = vmul.f32 %v2631_v38, %v2631_v38 }
0x1451   : > { %v2635_v26 = vsel %vm980_vm1, %v2633_v39, 0.0  ;;  %v2634_v40 = vmul.f32 %v2632_v0, %v2632_v0 }
0x1452   : > { %2636 = vadd.xlane.f32.xlu0 %v2635_v26 }
0x1453   : > { %v2638_v41 = vsel %vm980_vm1, %v2634_v40, 0.0 }
0x1454   : > { %2639 = vadd.xlane.f32.xlu1 %v2638_v41 }
0x14df   : > { %v2637_v46 = vpop.xlane.xlu0 %2636 }
0x14e0   : > { %v2641_v42 = vmul.f32 0.015625, %v2637_v46 }
0x14e1   : > { %v2640_v43 = vpop.xlane.xlu1 %2639 }
0x14e2   : > { %v2643_v44 = vadd.f32 1e-12, %v2641_v42  ;;  %v2642_v47 = vmul.f32 0.015625, %v2640_v43 }
0x14e4   : > { %3942 = vrsqrt.f32 %v2643_v44  ;;  %v2644_v48 = vadd.f32 1e-12, %v2642_v47 }
0x14e6   : > { %3944 = vrsqrt.f32 %v2644_v48 }
0x14ee   : > { %v3943_v50 = vpop.eup %3942 }
0x14ef   : > { %v2647_v52 = vmul.f32 %v3943_v50, %v2631_v38 }
0x14f0   : > { %v3945_v53 = vpop.eup %3944 }
0x14f1   : > { %v2655_v54 = vmul.f32 %v3507_v13, %v2647_v52  ;;  %v2648_v55 = vmul.f32 %v3945_v53, %v2632_v0 }
0x14f3   : > { %v2656_v58 = vmul.f32 %v3507_v13, %v2648_v55  ;;  %v4693_v59 = vadd.f32 %v3508_v56, %v2655_v54 }
0x14f5   : > { %v4695_v60 = vadd.f32 %v3508_v56, %v2656_v58 }
0x14f7   : > { %v2665_v20 = vpack.c.bf16 %v4695_v60, %v4693_v59 }
0x14f9   : > { %3767 = vmatmul.mubr.msk.bf16.vlgmr.msra.gmra.mrb[48].mxu1 %vm980_vm1, %v2665_v20 }
0x15cc   : > { %v2742_v10 = vpop.f32.mrb[48].mxu1 }
0x15cd   : > { %v2743_v12 = vadd.f32 %v3509_v9, %v2742_v10  ;;  %v3768_v16 = vpop.f32.mrb[49].mxu1 }
0x15ce   : > { %v2745_v17 = vpop.f32.mrb[50].mxu1 }
0x15cf   : > { %v2751_v14 = vmul.f32 0.70710677, %v2743_v12  ;;  %v2746_v19 = vadd.f32 %v3509_v9, %v2745_v17  ;;  %v3769_v22 = vpop.f32.mrb[51].mxu1  ;;  %v2749_v58 = vmul.f32 0.5, %v2743_v12 }
0x15d1   : > { %v2753_v23 = vand.u32 2147483647, %v2751_v14  ;;  %v2752_v24 = vmul.f32 0.70710677, %v2746_v19  ;;  %vm2791_vm14 = vcmp.ge.f32.partialorder %v2751_v14, 0.0  ;;  %v2750_v20 = vmul.f32 0.5, %v2746_v19 }
0x15d3   : > { %v2755_v25 = vmul.f32 0.3275911, %v2753_v23  ;;  %v2754_v11 = vand.u32 2147483647, %v2752_v24  ;;  %v2779_v29 = vmul.f32 %v2753_v23, %v2753_v23  ;;  %vm2792_vm15 = vcmp.ge.f32.partialorder %v2752_v24, 0.0 }
0x15d5   : > { %v2757_v27 = vadd.f32 1.0, %v2755_v25  ;;  %v2756_v6 = vmul.f32 0.3275911, %v2754_v11  ;;  %v2780_v18 = vmul.f32 %v2754_v11, %v2754_v11  ;;  %v2781_v30 = vsub.f32 0.0, %v2779_v29 }
0x15d7   : > { %3946 = vrcp.f32 %v2757_v27  ;;  %v2758_v62 = vadd.f32 1.0, %v2756_v6  ;;  %v2782_v57 = vsub.f32 0.0, %v2780_v18  ;;  %v2783_v32 = vmul.f32 1.442695, %v2781_v30 }
0x15d9   : > { %3948 = vrcp.f32 %v2758_v62  ;;  %v2785_v38 = vmul.f32 1.442695, %v2782_v57  ;;  %v3524_v57 = vld [vmem:[%s908_s2] ss:$0 sm:$0xff]  ;;  %s4910_s2 = sld [smem:[#allocation18_spill]] (!%p3526_p6) }
0x15da   : > { %3950 = vpow2.f32 %v2783_v32 }
0x15db   : > { %3952 = vpow2.f32 %v2785_v38 }
0x15e1   : > { %v3947_v49 = vpop.eup %3946 }
0x15e2   : > { %v2761_v21 = vmul.f32 1.0614054, %v3947_v49 }
0x15e3   : > { %v3949_v3 = vpop.eup %3948 }
0x15e4   : > { %v2763_v31 = vadd.f32 -1.4531521, %v2761_v21  ;;  %v2762_v33 = vmul.f32 1.0614054, %v3949_v3  ;;  %v3951_v46 = vpop.eup %3950 }
0x15e5   : > { %v3953_v47 = vpop.eup %3952 }
0x15e6   : > { %v2765_v34 = vmul.f32 %v3947_v49, %v2763_v31  ;;  %v2764_v35 = vadd.f32 -1.4531521, %v2762_v33 }
0x15e8   : > { %v2767_v37 = vadd.f32 1.4214138, %v2765_v34  ;;  %v2766_v28 = vmul.f32 %v3949_v3, %v2764_v35  ;;  %v3525_v34 = vld [vmem:[%s911_s29] ss:$0 sm:$0xff] }
0x15ea   : > { %v2769_v0 = vmul.f32 %v3947_v49, %v2767_v37  ;;  %v2768_v39 = vadd.f32 1.4214138, %v2766_v28 }
0x15ec   : > { %v2771_v26 = vadd.f32 -0.28449672, %v2769_v0  ;;  %v2770_v40 = vmul.f32 %v3949_v3, %v2768_v39  ;;  %v3960_v39 = vld [vmem:[%s4905_s28] sm:$0xff] (!%p3526_p6)  }
0x15ee   : > { %v2773_v41 = vmul.f32 %v3947_v49, %v2771_v26  ;;  %v2772_v15 = vadd.f32 -0.28449672, %v2770_v40  ;;  %v4016_v26 = vmov (!%p3526_p6), 0.0   ;;  %v3961_v40 = vld [vmem:[%s4906_s5 + $0x8] sm:$0xff] (!%p3526_p6)  }
0x15ef   : > { %3790 = vmatprep.subr.bf16.mxu0 (!%p3526_p6), %v4016_v26  ;;  %3802 = vmatprep.subr.bf16.mxu1 (!%p3526_p6), %v4016_v26 }
0x15f0   : > { %v2775_v36 = vadd.f32 0.2548296, %v2773_v41  ;;  %v2774_v7 = vmul.f32 %v3949_v3, %v2772_v15  ;;  %3806 = vmatprep.mubr.msk.bf16.mxu1 (!%p3526_p6), %vm4017_vm0, %v4016_v26  ;;  %v3962_v41 = vld [vmem:[%s4906_s5 + $0x10] sm:$0xff] (!%p3526_p6)   ;;  %v3963_v15 = vld [vmem:[%s4906_s5 + $0x18] sm:$0xff] (!%p3526_p6)  }
0x15f2   : > { %v2777_v45 = vmul.f32 %v3947_v49, %v2775_v36  ;;  %v2776_v42 = vadd.f32 0.2548296, %v2774_v7  ;;  %v3527_v7 = vld [vmem:[%s4907_s14] ss:$0 sm:$0xff] (!%p3526_p6) }
0x15f4   : > { %v2787_v43 = vmul.f32 %v3951_v46, %v2777_v45  ;;  %v2778_v44 = vmul.f32 %v3949_v3, %v2776_v42 }
0x15f6   : > { %v2789_v48 = vsub.f32 1.0, %v2787_v43  ;;  %v2788_v50 = vmul.f32 %v3953_v47, %v2778_v44 }
0x15f8   : > { %v2793_v13 = vsub.f32 0.0, %v2789_v48  ;;  %v2790_v52 = vsub.f32 1.0, %v2788_v50 }
0x15fa   : > { %v2795_v53 = vsel %vm2791_vm14, %v2789_v48, %v2793_v13  ;;  %v2794_v54 = vsub.f32 0.0, %v2790_v52 }
0x15fb   : > { %v2797_v55 = vadd.f32 1.0, %v2795_v53 }
0x15fc   : > { %v2796_v56 = vsel %vm2792_vm15, %v2790_v52, %v2794_v54 }
0x15fd   : > { %v2798_v61 = vadd.f32 1.0, %v2796_v56  ;;  %v2799_v63 = vmul.f32 %v2797_v55, %v2749_v58 }
0x15ff   : > { %v2800_v1 = vmul.f32 %v2798_v61, %v2750_v20 }
0x1601   : > { %v2801_v2 = vpack.c.bf16 %v2800_v1, %v2799_v63  ;;  %v3964_v1 = vld [vmem:[%s4908_s15] sm:$0xff] (!%p3526_p6)  }
0x1602   : > { %3803 = vmatpush3.bf16.msra.mxu1 (!%p3526_p6), %v3964_v1 }
0x1603   : > { %3787 = vmatmul.mubr.bf16.vlgmr.msra.gmra.mrb[40].mxu0 %v2801_v2  ;;  %v3965_v2 = vld [vmem:[%s4908_s15 + $0x8] sm:$0xff] (!%p3526_p6)   ;;  %3804 = vmatprep.subr.bf16.mxu1 (!%p3526_p6), %v4016_v26 }
0x1604   : > { %3791 = vmatpush3.bf16.msra.mxu0 (!%p3526_p6), %v3960_v39  ;;  %3798 = vmatprep.mubr.msk.bf16.mxu0 (!%p3526_p6), %vm4017_vm0, %v4016_v26 }
0x1605   : > { %3792 = vmatprep.subr.bf16.mxu0 (!%p3526_p6), %v4016_v26 }
0x1606   : > { %3805 = vmatpush3.bf16.msra.mxu1 (!%p3526_p6), %v3965_v2 }
0x1607   : > { %3810 = vmatprep.subr.bf16.mxu1 (!%p3526_p6), %v4016_v26 }
0x1608   : > { %3793 = vmatpush3.bf16.msra.mxu0 (!%p3526_p6), %v3961_v40 }
0x1609   : > { %3794 = vmatprep.subr.bf16.mxu0 (!%p3526_p6), %v4016_v26 }
0x160c   : > { %3795 = vmatpush3.bf16.msra.mxu0 (!%p3526_p6), %v3962_v41 }
0x160d   : > { %3796 = vmatprep.subr.bf16.mxu0 (!%p3526_p6), %v4016_v26 }
0x1610   : > { %3797 = vmatpush3.bf16.msra.mxu0 (!%p3526_p6), %v3963_v15 }
0x16d6   : > { %v2907_v4 = vpop.f32.mrb[40].mxu0 }
0x16d7   : > { %v2908_v5 = vadd.f32 %v3515_v51, %v2907_v4  ;;  %v3788_v8 = vpop.f32.mrb[41].mxu0 }
0x16d8   : > { %v2910_v9 = vpop.f32.mrb[42].mxu0 }
0x16d9   : > { %v2914_v10 = vadd.f32 %v2908_v5, %v4693_v59  ;;  %v2911_v16 = vadd.f32 %v3515_v51, %v2910_v9  ;;  %v3789_v17 = vpop.f32.mrb[43].mxu0 }
0x16da   : > { %v3533_v17 = vld [vmem:[%s4909_s22] ss:$0 sm:$0xff] (!%p3526_p6) }
0x16db   : > { %v2915_v12 = vadd.f32 %v2911_v16, %v4695_v60  ;;  %v2918_v14 = vsel %vm980_vm1, %v2914_v10, 0.0 }
0x16dc   : > { %2919 = vadd.xlane.f32.xlu0 %v2918_v14 }
0x16dd   : > { %v2921_v19 = vsel %vm980_vm1, %v2915_v12, 0.0 }
0x16de   : > { %2922 = vadd.xlane.f32.xlu1 %v2921_v19 }
0x1769   : > { %v2920_v22 = vpop.xlane.xlu0 %2919 }
0x176a   : > { %v2924_v23 = vmul.f32 0.015625, %v2920_v22  ;;  %v3534_v22 = vld [vmem:[%s4910_s2] ss:$0 sm:$0xff] (!%p3526_p6) }
0x176b   : > { %v2923_v24 = vpop.xlane.xlu1 %2922 }
0x176c   : > { %v2926_v25 = vsub.f32 %v2914_v10, %v2924_v23  ;;  %v2925_v11 = vmul.f32 0.015625, %v2923_v24 }
0x176e   : > { %v2927_v27 = vsub.f32 %v2915_v12, %v2925_v11  ;;  %v2928_v6 = vmul.f32 %v2926_v25, %v2926_v25 }
0x1770   : > { %v2930_v59 = vsel %vm980_vm1, %v2928_v6, 0.0  ;;  %v2929_v62 = vmul.f32 %v2927_v27, %v2927_v27 }
0x1771   : > { %2931 = vadd.xlane.f32.xlu0 %v2930_v59  ;;  %v3966_v59 = vld [vmem:[%s4911_s4] sm:$0xff] (!%p3526_p6)  }
0x1772   : > { %v2933_v60 = vsel %vm980_vm1, %v2929_v62, 0.0 }
0x1773   : > { %2934 = vadd.xlane.f32.xlu1 %v2933_v60  ;;  %v3967_v60 = vld [vmem:[%s4911_s4 + $0x8] sm:$0xff] (!%p3526_p6)  }
0x17fe   : > { %v2932_v29 = vpop.xlane.xlu0 %2931 }
0x17ff   : > { %v2936_v18 = vmul.f32 0.015625, %v2932_v29  ;;  %v3968_v29 = vld [vmem:[%s4911_s4 + $0x10] sm:$0xff] (!%p3526_p6)  }
0x1800   : > { %v2935_v49 = vpop.xlane.xlu1 %2934 }
0x1801   : > { %v2938_v30 = vadd.f32 1e-12, %v2936_v18  ;;  %v2937_v21 = vmul.f32 0.015625, %v2935_v49  ;;  %v3969_v18 = vld [vmem:[%s4911_s4 + $0x18] sm:$0xff] (!%p3526_p6)   ;;  %v3535_v49 = vld [vmem:[%s4912_s19] ss:$0 sm:$0xff] (!%p3526_p6) }
0x1803   : > { %3954 = vrsqrt.f32 %v2938_v30  ;;  %v2939_v3 = vadd.f32 1e-12, %v2937_v21 }
0x1805   : > { %3956 = vrsqrt.f32 %v2939_v3 }
0x180d   : > { %v3955_v31 = vpop.eup %3954 }
0x180e   : > { %v2942_v32 = vmul.f32 %v3955_v31, %v2926_v25 }
0x180f   : > { %v3957_v33 = vpop.eup %3956 }
0x1810   : > { %v2950_v35 = vmul.f32 %v3524_v57, %v2942_v32  ;;  %v2943_v37 = vmul.f32 %v3957_v33, %v2927_v27  ;;  %2965 = sbr.rel (%p3526_p6) target bundleno = 6936 (0x1b18), region = 116  ;;  %v3539_v33 = vld [vmem:[%s4914_s16] ss:$0 sm:$0xff] (!%p3526_p6) }
0x1812   : > { %v2958_v38 = vadd.f32 %v3525_v34, %v2950_v35  ;;  %v2951_v28 = vmul.f32 %v3524_v57, %v2943_v37 }
0x1814   : > { %2960 = vst.msk [vmem:[#allocation2] sm:$0xff] %vm980_vm1, %v2958_v38  ;;  %v2959_v0 = vadd.f32 %v3525_v34, %v2951_v28 }
0x1816   : > { %2961 = vst.msk [vmem:[#allocation2 + $0x8] sm:$0xff] %vm980_vm1, %v2959_v0  ;;  %v4765_v36 = vpack.c.bf16 (!%p3526_p6), %v2959_v0, %v2958_v38 }
0x1818   : > { %3799 = vmatmul.mubr.msk.bf16.vlgmr.msra.gmra.mrb[0].mxu0 %vm980_vm1, %v4765_v36 }
0x18eb   : > { %v3043_v45 = vpop.f32.mrb[0].mxu0 }
0x18ec   : > { %v3044_v46 = vadd.f32 %v3527_v7, %v3043_v45  ;;  %v3800_v42 = vpop.f32.mrb[1].mxu0 }
0x18ed   : > { %v3046_v43 = vpop.f32.mrb[2].mxu0 }
0x18ee   : > { %v3047_v44 = vadd.f32 %v3527_v7, %v3046_v43  ;;  %v3801_v47 = vpop.f32.mrb[3].mxu0  ;;  %v3052_v48 = vsel %vm2537_vm12, %v3044_v46, 0.0 }
0x18ef   : > { %3053 = vadd.xlane.f32.xlu0 %v3052_v48 }
0x18f0   : > { %v3055_v50 = vsel %vm2537_vm12, %v3047_v44, 0.0 }
0x18f3   : > { %3056 = vadd.xlane.f32.xlu0 %v3055_v50 }
0x197c   : > { %v3054_v13 = vpop.xlane.xlu0 %3053 }
0x197d   : > { %v3059_v52 = vmul.f32 0.03125, %v3054_v13 }
0x197f   : > { %v3061_v53 = vsub.f32 %v3044_v46, %v3059_v52 }
0x1980   : > { %v3057_v54 = vpop.xlane.xlu0 %3056 }
0x1981   : > { %v3060_v55 = vmul.f32 0.03125, %v3057_v54  ;;  %v3063_v56 = vmul.f32 %v3061_v53, %v3061_v53 }
0x1983   : > { %v3062_v58 = vsub.f32 %v3047_v44, %v3060_v55  ;;  %v3065_v20 = vsel %vm2537_vm12, %v3063_v56, 0.0 }
0x1984   : > { %3066 = vadd.xlane.f32.xlu1 %v3065_v20 }
0x1985   : > { %v3064_v61 = vmul.f32 %v3062_v58, %v3062_v58 }
0x1987   : > { %v3068_v63 = vsel %vm2537_vm12, %v3064_v61, 0.0 }
0x1988   : > { %3069 = vadd.xlane.f32.xlu1 %v3068_v63 }
0x1a11   : > { %v3067_v51 = vpop.xlane.xlu1 %3066 }
0x1a12   : > { %v3071_v4 = vmul.f32 0.03125, %v3067_v51 }
0x1a14   : > { %v3073_v5 = vadd.f32 1e-05, %v3071_v4 }
0x1a15   : > { %v3070_v8 = vpop.xlane.xlu1 %3069 }
0x1a16   : > { %3970 = vrsqrt.f32 %v3073_v5  ;;  %v3072_v9 = vmul.f32 0.03125, %v3070_v8 }
0x1a18   : > { %v3074_v10 = vadd.f32 1e-05, %v3072_v9 }
0x1a1a   : > { %3972 = vrsqrt.f32 %v3074_v10 }
0x1a20   : > { %v3971_v16 = vpop.eup %3970 }
0x1a21   : > { %v3077_v12 = vmul.f32 %v3971_v16, %v3061_v53 }
0x1a23   : > { %v3085_v14 = vmul.f32 %v3533_v17, %v3077_v12 }
0x1a24   : > { %v3973_v19 = vpop.eup %3972 }
0x1a25   : > { %v3078_v23 = vmul.f32 %v3973_v19, %v3062_v58  ;;  %v3093_v25 = vadd.f32 %v3534_v22, %v3085_v14 }
0x1a27   : > { %v3086_v24 = vmul.f32 %v3533_v17, %v3078_v23  ;;  %v3095_v27 = vmax.f32 %v3093_v25, 0.0 }
0x1a29   : > { %v3094_v11 = vadd.f32 %v3534_v22, %v3086_v24 }
0x1a2b   : > { %v3096_v6 = vmax.f32 %v3094_v11, 0.0 }
0x1a2d   : > { %v3097_v62 = vpack.c.bf16 %v3096_v6, %v3095_v27 }
0x1a2f   : > { %3807 = vmatmul.mubr.msk.bf16.vlgmr.msra.gmra.mrb[0].mxu1 %vm2537_vm12, %v3097_v62 }
0x1a30   : > { %3811 = vmatpush3.bf16.msra.mxu1 %v3966_v59  ;;  %3818 = vmatprep.mubr.msk.bf16.mxu1 %vm4017_vm0, %v4016_v26 }
0x1a31   : > { %3812 = vmatprep.subr.bf16.mxu1 %v4016_v26 }
0x1a34   : > { %3813 = vmatpush3.bf16.msra.mxu1 %v3967_v60 }
0x1a35   : > { %3814 = vmatprep.subr.bf16.mxu1 %v4016_v26 }
0x1a38   : > { %3815 = vmatpush3.bf16.msra.mxu1 %v3968_v29 }
0x1a39   : > { %3816 = vmatprep.subr.bf16.mxu1 %v4016_v26 }
0x1a3c   : > { %3817 = vmatpush3.bf16.msra.mxu1 %v3969_v18 }
0x1a3f   : > { %3819 = vmatmul.mubr.msk.bf16.vlgmr.msra.gmra.mrb[4].mxu1 %vm980_vm1, %v4765_v36 }
0x1b02   : > { %v3158_v30 = vpop.f32.mrb[0].mxu1 }
0x1b03   : > { %v3159_v21 = vadd.f32 %v3535_v49, %v3158_v30  ;;  %v3808_v3 = vpop.f32.mrb[1].mxu1 }
0x1b04   : > { %v3161_v31 = vpop.f32.mrb[2].mxu1 }
0x1b05   : > { %3245 = vst [vmem:[%s4913_s20] sm:$0xff] %v3159_v21  ;;  %v3162_v57 = vadd.f32 %v3535_v49, %v3161_v31  ;;  %v3809_v32 = vpop.f32.mrb[3].mxu1 }
0x1b07   : > { %3247 = vst [vmem:[%s4913_s20 + $0x10] sm:$0xff] %v3162_v57 }
0x1b12   : > { %v3238_v34 = vpop.f32.mrb[4].mxu1 }
0x1b13   : > { %v3239_v35 = vadd.f32 %v3539_v33, %v3238_v34  ;;  %v3820_v37 = vpop.f32.mrb[5].mxu1 }
0x1b14   : > { %v3241_v38 = vpop.f32.mrb[6].mxu1 }
0x1b15   : > { %3246 = vst [vmem:[%s4913_s20 + $0x8] sm:$0xff] %v3239_v35  ;;  %v3242_v28 = vadd.f32 %v3539_v33, %v3241_v38  ;;  %v3821_v0 = vpop.f32.mrb[7].mxu1 }
0x1b17   : > { %3248 = vst [vmem:[%s4913_s20 + $0x18] sm:$0xff] %v3242_v28 }
0x1b18 PF: > { %s4915_s3 = sld [smem:[#allocation4_spill]]  ;;  %s4917_s28 = sld [smem:[#allocation5_spill]] }
0x1b1e   : > { %s32_s29 = sadd.s32 1, %s4915_s3   ;;  %s4916_s3 = sld [smem:[#allocation3_spill]] }
0x1b1f   : > { %p29_p7 = scmp.ge.s32.totalorder %s32_s29, 4  }
0x1b21   :  { %31 = sbr.rel (!%p29_p7) target bundleno = 17 (0x11), region = 185 }

</bundles_post_ra>
